<compile_context>
chip_gen: v7x
topology: tpu7x:2x2x1
jax: 0.10.0
libtpu: 0.0.40
codegen_flags: <defaults>
</compile_context>

<pallas_src>
import jax
import jax.numpy as jnp
from jax import lax
from jax.experimental import pallas as pl
from jax.experimental.pallas import tpu as pltpu

NEG_SLOPE = 0.01     # nn.LeakyReLU default negative_slope
BN_EPS = 1e-5        # nn.BatchNorm2d default eps


def _round_up(v, m):
    return (v + m - 1) // m * m


def _vmem_limit_bytes():
    """Generation-aware VMEM cap (v5e/v6e: 128 MiB physical, v7x: 64 MiB)."""
    try:
        cap = pltpu.get_tpu_info().vmem_capacity_bytes
    except Exception:
        cap = 64 * 1024 * 1024
    return int(min(cap * 3 // 4, 96 * 1024 * 1024))


def _pick_tb(n, ho, wo, c, budget):
    """Output rows per band: largest tile whose double-buffered, lane/sublane
    padded VMEM footprint fits the budget. TB*Wo is the per-tile MXU M dim."""
    lane_c = _round_up(c, 128)

    def need(tb):
        ph_blk = 4 * (tb + 1) * _round_up(wo + 1, 8) * lane_c    # phase input block
        out_blk = _round_up(tb * wo, 8) * lane_c                 # output tile / conv acc
        val_blk = 8 * _round_up(tb * wo, 128)                    # validity row
        w_blk = 9 * _round_up(c, 8) * lane_c                     # per-tap weights
        return (2 * (ph_blk + out_blk + val_blk) + out_blk + w_blk) * 4

    tb = ho
    while tb > 1 and need(tb) > budget:
        tb = (tb + 1) // 2
    # v7x has 2 TensorCores per chip: give the ("parallel","parallel") grid at
    # least 2 steps to shard across them.
    if n * pl.cdiv(ho, tb) < 2 and ho > 1:
        tb = pl.cdiv(ho, 2)
    return tb


@jax.jit
def downsample(x_nchw, weight, gamma, beta):
    """Forward of DownSample.

    x_nchw : (N, C, H, W) float32
    weight : (C, C, 3, 3) float32  (PyTorch OIHW conv weight, bias=False)
    gamma  : (C,) float32          (BN weight)
    beta   : (C,) float32          (BN bias)
    returns (N, C, Ho, Wo) float32 with Ho = floor((H-1)/2)+1, Wo likewise.
    """
    N, C, H, W = x_nchw.shape
    Ho = (H - 1) // 2 + 1
    Wo = (W - 1) // 2 + 1
    M_total = N * Ho * Wo

    vmem_limit = _vmem_limit_bytes()
    TB = _pick_tb(N, Ho, Wo, C, budget=vmem_limit // 2)
    NB = pl.cdiv(Ho, TB)
    TWm = TB * Wo          # per-tile matmul M dim
    Wo1 = Wo + 1
    R = NB * TB + 1        # phase rows needed (incl. the 1-row halo)

    # ---- wrapper glue (pure data movement, fused by XLA): NHWC, reflect pad,
    #      zero-pad to the banded extent, 4-phase split, per-band halo gather ----
    x = jnp.transpose(x_nchw, (0, 2, 3, 1)).astype(jnp.float32)          # (N,H,W,C)
    xp = jnp.pad(x, ((0, 0), (1, 1), (1, 1), (0, 0)), mode="reflect")    # (N,H+2,W+2,C)
    xp = jnp.pad(xp, ((0, 0), (0, 2 * R - (H + 2)), (0, 2 * Wo1 - (W + 2)), (0, 0)))
    ph = xp.reshape(N, R, 2, Wo1, 2, C).transpose(0, 2, 4, 1, 3, 5)
    ph = ph.reshape(N, 4, R, Wo1, C)                                     # phase p = pr*2+pc
    ridx = jnp.arange(NB)[:, None] * TB + jnp.arange(TB + 1)[None, :]    # (NB, TB+1)
    ph_b = ph[:, :, ridx].transpose(0, 2, 1, 3, 4, 5)                    # (N,NB,4,TB+1,Wo1,C)

    # per-tap weight matrices: w9[kh*3+kw, ci, co] = weight[co, ci, kh, kw]
    w9 = jnp.transpose(weight, (2, 3, 1, 0)).reshape(9, C, C).astype(jnp.float32)

    # per-band row-validity mask (bands may run past Ho); it doubles as the
    # "ones" row of the MXU stats reduction.
    valid = (jnp.arange(NB * TB) < Ho).astype(jnp.float32)
    valid = jnp.broadcast_to(valid.reshape(NB, TB, 1), (NB, TB, Wo)).reshape(NB, 1, TWm)

    def _conv_tile(ph_ref, w_ref):
        """Conv tile as 9 per-tap MXU matmuls accumulated in f32 -> (TB*Wo, C)."""
        acc = None
        for kh in range(3):
            for kw in range(3):
                p = (kh % 2) * 2 + (kw % 2)
                dr, dc = kh // 2, kw // 2
                tap = ph_ref[p, dr:dr + TB, dc:dc + Wo, :].reshape(TWm, C)
                d = jnp.dot(tap, w_ref[kh * 3 + kw],
                            preferred_element_type=jnp.float32)
                acc = d if acc is None else acc + d
        return acc

    def _stats_kernel(ph_ref, w_ref, valid_ref, stats_ref):
        acc = _conv_tile(ph_ref, w_ref)                    # (TWm, C) f32
        m = valid_ref[...]                                 # (1, TWm)
        # per-channel sum / sum-of-squares on the MXU (invalid rows masked to 0)
        stats_ref[0:1, :] = jnp.dot(m, acc, preferred_element_type=jnp.float32)
        stats_ref[1:2, :] = jnp.dot(m, acc * acc, preferred_element_type=jnp.float32)

    def _fwd_kernel(ph_ref, w_ref, scale_ref, bias_ref, out_ref):
        acc = _conv_tile(ph_ref, w_ref)                    # (TWm, C) f32
        y = acc * scale_ref[...] + bias_ref[...]           # folded BN as one FMA
        out_ref[...] = jnp.maximum(y, NEG_SLOPE * y)       # LeakyReLU

    ph_spec = pl.BlockSpec((None, None, 4, TB + 1, Wo1, C),
                           lambda n, b: (n, b, 0, 0, 0, 0))
    w_spec = pl.BlockSpec((9, C, C), lambda n, b: (0, 0, 0))
    cparams = pltpu.CompilerParams(
        dimension_semantics=("parallel", "parallel"),
        vmem_limit_bytes=vmem_limit)

    # ---- pass 1: conv (not stored) + per-tile partial BN statistics ----
    stats = pl.pallas_call(
        _stats_kernel,
        out_shape=jax.ShapeDtypeStruct((N, NB, 2, C), jnp.float32),
        grid=(N, NB),
        in_specs=[ph_spec, w_spec,
                  pl.BlockSpec((None, 1, TWm), lambda n, b: (b, 0, 0))],
        out_specs=pl.BlockSpec((None, None, 2, C), lambda n, b: (n, b, 0, 0)),
        compiler_params=cparams,
    )(ph_b, w9, valid)

    # ---- global training-mode BN stats (tiny C-length math) folded to scale/bias ----
    tot = jnp.sum(stats, axis=(0, 1))                       # (2, C)
    mean = tot[0] / M_total
    var = jnp.maximum(tot[1] / M_total - mean * mean, 0.0)  # biased variance
    # TODO(synk): variance uses E[x^2]-E[x]^2 in one f32 pass (PyTorch is effectively
    # two-pass); adequate here, may lose digits for very large, offset activations.
    scale = gamma.astype(jnp.float32) * lax.rsqrt(var + BN_EPS)
    bias = beta.astype(jnp.float32) - mean * scale

    # ---- pass 2: recompute conv tile, fused BN FMA + LeakyReLU, store final NHWC ----
    out_b = pl.pallas_call(
        _fwd_kernel,
        out_shape=jax.ShapeDtypeStruct((N, NB, TWm, C), jnp.float32),
        grid=(N, NB),
        in_specs=[ph_spec, w_spec,
                  pl.BlockSpec((1, C), lambda n, b: (0, 0)),
                  pl.BlockSpec((1, C), lambda n, b: (0, 0))],
        out_specs=pl.BlockSpec((None, None, TWm, C), lambda n, b: (n, b, 0, 0)),
        compiler_params=cparams,
    )(ph_b, w9, scale.reshape(1, C), bias.reshape(1, C))

    # TODO(synk): nn.BatchNorm2d running_mean/running_var buffer updates are not
    # emitted (training-time module state; the forward output is unaffected).
    out = out_b.reshape(N, NB * TB, Wo, C)[:, :Ho]          # drop padded band rows
    return jnp.transpose(out, (0, 3, 1, 2))                 # NCHW


def _reference(x_nchw, weight, gamma, beta):
    """Pure-JAX f32 reference of the PyTorch module (training-mode BatchNorm)."""
    xp = jnp.pad(x_nchw, ((0, 0), (0, 0), (1, 1), (1, 1)), mode="reflect")
    out = lax.conv_general_dilated(
        xp, weight, window_strides=(2, 2), padding="VALID",
        dimension_numbers=("NCHW", "OIHW", "NCHW"),
        precision=lax.Precision.HIGHEST)
    mean = jnp.mean(out, axis=(0, 2, 3), keepdims=True)
    var = jnp.mean((out - mean) ** 2, axis=(0, 2, 3), keepdims=True)
    y = (out - mean) * lax.rsqrt(var + BN_EPS)
    y = y * gamma.reshape(1, -1, 1, 1) + beta.reshape(1, -1, 1, 1)
    return jnp.where(y >= 0, y, NEG_SLOPE * y)


if __name__ == "__main__":
    key = jax.random.PRNGKey(0)
    k_x, k_w = jax.random.split(key)

    N, C, H, W = 2, 4, 16, 16
    x = jax.random.normal(k_x, (N, C, H, W), dtype=jnp.float32)
    # Deterministic synthetic parameters (module __init__ shapes):
    weight = 0.1 * jax.random.normal(k_w, (C, C, 3, 3), dtype=jnp.float32)  # Conv2d weight
    gamma = jnp.ones((C,), dtype=jnp.float32)                               # BN weight init
    beta = jnp.zeros((C,), dtype=jnp.float32)                               # BN bias init

    y = downsample(x, weight, gamma, beta)
    jax.block_until_ready(y)

    y_ref = _reference(x, weight, gamma, beta)
    assert y.shape == (N, C, H // 2, W // 2), y.shape
    # Documented tolerance: the kernel conv runs in f32 on the MXU; 2e-3 also
    # covers a bf16-multiply MXU path on older generations.
    err = float(jnp.max(jnp.abs(y - y_ref)))
    assert jnp.allclose(y, y_ref, atol=2e-3, rtol=2e-3), err

    print("KERNEL_OK")
</pallas_src>

<mosaic_0001>
module attributes {stable_mosaic.version = 11 : i64} {
  func.func @_stats_kernel(%arg0: i32, %arg1: i32, %arg2: memref<1x1x4x9x9x4xf32, #tpu.memory_space<vmem>>, %arg3: memref<9x4x4xf32, #tpu.memory_space<vmem>>, %arg4: memref<1x1x64xf32, #tpu.memory_space<vmem>>, %arg5: memref<1x1x2x4xf32, #tpu.memory_space<vmem>>) attributes {dimension_semantics = [#tpu.dimension_semantics<parallel>, #tpu.dimension_semantics<parallel>], iteration_bounds = array<i64: 2, 1>, scalar_prefetch = 0 : i64, scratch_operands = 0 : i64, tpu.core_type = #tpu.core_type<tc>, window_params = [{transform_indices = @transform_0, window_bounds = array<i64: 1, 1, 4, 9, 9, 4>}, {pipeline_mode = #tpu.pipeline_mode<synchronous>, transform_indices = @transform_1, window_bounds = array<i64: 9, 4, 4>}, {transform_indices = @transform_2, window_bounds = array<i64: 1, 1, 64>}, {transform_indices = @transform_3, window_bounds = array<i64: 1, 1, 2, 4>}]} {
    %c0 = arith.constant 0 : index
    %c0_0 = arith.constant 0 : index
    %c0_1 = arith.constant 0 : index
    %c0_2 = arith.constant 0 : index
    %c0_3 = arith.constant 0 : index
    %c0_4 = arith.constant 0 : index
    %0 = vector.load %arg2[%c0, %c0_0, %c0_1, %c0_2, %c0_3, %c0_4] : memref<1x1x4x9x9x4xf32, #tpu.memory_space<vmem>>, vector<1x1x1x8x8x4xf32>
    %1 = vector.shape_cast %0 : vector<1x1x1x8x8x4xf32> to vector<8x8x4xf32>
    %2 = vector.shape_cast %1 : vector<8x8x4xf32> to vector<64x4xf32>
    %c0_5 = arith.constant 0 : index
    %c0_6 = arith.constant 0 : index
    %c0_7 = arith.constant 0 : index
    %3 = vector.load %arg3[%c0_5, %c0_6, %c0_7] : memref<9x4x4xf32, #tpu.memory_space<vmem>>, vector<1x4x4xf32>
    %4 = vector.shape_cast %3 : vector<1x4x4xf32> to vector<4x4xf32>
    %cst = arith.constant dense<0.000000e+00> : vector<64x4xf32>
    %5 = tpu.matmul %2, %4, %cst {dimension_numbers = #tpu.dot_dimension_numbers<[1], [0], [0], [1], [0, 0, 1, 1], [], []>} : vector<64x4xf32>, vector<4x4xf32>, vector<64x4xf32> -> vector<64x4xf32>
    %c0_8 = arith.constant 0 : index
    %c0_9 = arith.constant 0 : index
    %c1 = arith.constant 1 : index
    %c0_10 = arith.constant 0 : index
    %c0_11 = arith.constant 0 : index
    %c0_12 = arith.constant 0 : index
    %6 = vector.load %arg2[%c0_8, %c0_9, %c1, %c0_10, %c0_11, %c0_12] : memref<1x1x4x9x9x4xf32, #tpu.memory_space<vmem>>, vector<1x1x1x8x8x4xf32>
    %7 = vector.shape_cast %6 : vector<1x1x1x8x8x4xf32> to vector<8x8x4xf32>
    %8 = vector.shape_cast %7 : vector<8x8x4xf32> to vector<64x4xf32>
    %c1_13 = arith.constant 1 : index
    %c0_14 = arith.constant 0 : index
    %c0_15 = arith.constant 0 : index
    %9 = vector.load %arg3[%c1_13, %c0_14, %c0_15] : memref<9x4x4xf32, #tpu.memory_space<vmem>>, vector<1x4x4xf32>
    %10 = vector.shape_cast %9 : vector<1x4x4xf32> to vector<4x4xf32>
    %cst_16 = arith.constant dense<0.000000e+00> : vector<64x4xf32>
    %11 = tpu.matmul %8, %10, %cst_16 {dimension_numbers = #tpu.dot_dimension_numbers<[1], [0], [0], [1], [0, 0, 1, 1], [], []>} : vector<64x4xf32>, vector<4x4xf32>, vector<64x4xf32> -> vector<64x4xf32>
    %12 = arith.addf %5, %11 : vector<64x4xf32>
    %c0_17 = arith.constant 0 : index
    %c0_18 = arith.constant 0 : index
    %c0_19 = arith.constant 0 : index
    %c0_20 = arith.constant 0 : index
    %c1_21 = arith.constant 1 : index
    %c0_22 = arith.constant 0 : index
    %13 = vector.load %arg2[%c0_17, %c0_18, %c0_19, %c0_20, %c1_21, %c0_22] : memref<1x1x4x9x9x4xf32, #tpu.memory_space<vmem>>, vector<1x1x1x8x8x4xf32>
    %14 = vector.shape_cast %13 : vector<1x1x1x8x8x4xf32> to vector<8x8x4xf32>
    %15 = vector.shape_cast %14 : vector<8x8x4xf32> to vector<64x4xf32>
    %c2 = arith.constant 2 : index
    %c0_23 = arith.constant 0 : index
    %c0_24 = arith.constant 0 : index
    %16 = vector.load %arg3[%c2, %c0_23, %c0_24] : memref<9x4x4xf32, #tpu.memory_space<vmem>>, vector<1x4x4xf32>
    %17 = vector.shape_cast %16 : vector<1x4x4xf32> to vector<4x4xf32>
    %cst_25 = arith.constant dense<0.000000e+00> : vector<64x4xf32>
    %18 = tpu.matmul %15, %17, %cst_25 {dimension_numbers = #tpu.dot_dimension_numbers<[1], [0], [0], [1], [0, 0, 1, 1], [], []>} : vector<64x4xf32>, vector<4x4xf32>, vector<64x4xf32> -> vector<64x4xf32>
    %19 = arith.addf %12, %18 : vector<64x4xf32>
    %c0_26 = arith.constant 0 : index
    %c0_27 = arith.constant 0 : index
    %c2_28 = arith.constant 2 : index
    %c0_29 = arith.constant 0 : index
    %c0_30 = arith.constant 0 : index
    %c0_31 = arith.constant 0 : index
    %20 = vector.load %arg2[%c0_26, %c0_27, %c2_28, %c0_29, %c0_30, %c0_31] : memref<1x1x4x9x9x4xf32, #tpu.memory_space<vmem>>, vector<1x1x1x8x8x4xf32>
    %21 = vector.shape_cast %20 : vector<1x1x1x8x8x4xf32> to vector<8x8x4xf32>
    %22 = vector.shape_cast %21 : vector<8x8x4xf32> to vector<64x4xf32>
    %c3 = arith.constant 3 : index
    %c0_32 = arith.constant 0 : index
    %c0_33 = arith.constant 0 : index
    %23 = vector.load %arg3[%c3, %c0_32, %c0_33] : memref<9x4x4xf32, #tpu.memory_space<vmem>>, vector<1x4x4xf32>
    %24 = vector.shape_cast %23 : vector<1x4x4xf32> to vector<4x4xf32>
    %cst_34 = arith.constant dense<0.000000e+00> : vector<64x4xf32>
    %25 = tpu.matmul %22, %24, %cst_34 {dimension_numbers = #tpu.dot_dimension_numbers<[1], [0], [0], [1], [0, 0, 1, 1], [], []>} : vector<64x4xf32>, vector<4x4xf32>, vector<64x4xf32> -> vector<64x4xf32>
    %26 = arith.addf %19, %25 : vector<64x4xf32>
    %c0_35 = arith.constant 0 : index
    %c0_36 = arith.constant 0 : index
    %c3_37 = arith.constant 3 : index
    %c0_38 = arith.constant 0 : index
    %c0_39 = arith.constant 0 : index
    %c0_40 = arith.constant 0 : index
    %27 = vector.load %arg2[%c0_35, %c0_36, %c3_37, %c0_38, %c0_39, %c0_40] : memref<1x1x4x9x9x4xf32, #tpu.memory_space<vmem>>, vector<1x1x1x8x8x4xf32>
    %28 = vector.shape_cast %27 : vector<1x1x1x8x8x4xf32> to vector<8x8x4xf32>
    %29 = vector.shape_cast %28 : vector<8x8x4xf32> to vector<64x4xf32>
    %c4 = arith.constant 4 : index
    %c0_41 = arith.constant 0 : index
    %c0_42 = arith.constant 0 : index
    %30 = vector.load %arg3[%c4, %c0_41, %c0_42] : memref<9x4x4xf32, #tpu.memory_space<vmem>>, vector<1x4x4xf32>
    %31 = vector.shape_cast %30 : vector<1x4x4xf32> to vector<4x4xf32>
    %cst_43 = arith.constant dense<0.000000e+00> : vector<64x4xf32>
    %32 = tpu.matmul %29, %31, %cst_43 {dimension_numbers = #tpu.dot_dimension_numbers<[1], [0], [0], [1], [0, 0, 1, 1], [], []>} : vector<64x4xf32>, vector<4x4xf32>, vector<64x4xf32> -> vector<64x4xf32>
    %33 = arith.addf %26, %32 : vector<64x4xf32>
    %c0_44 = arith.constant 0 : index
    %c0_45 = arith.constant 0 : index
    %c2_46 = arith.constant 2 : index
    %c0_47 = arith.constant 0 : index
    %c1_48 = arith.constant 1 : index
    %c0_49 = arith.constant 0 : index
    %34 = vector.load %arg2[%c0_44, %c0_45, %c2_46, %c0_47, %c1_48, %c0_49] : memref<1x1x4x9x9x4xf32, #tpu.memory_space<vmem>>, vector<1x1x1x8x8x4xf32>
    %35 = vector.shape_cast %34 : vector<1x1x1x8x8x4xf32> to vector<8x8x4xf32>
    %36 = vector.shape_cast %35 : vector<8x8x4xf32> to vector<64x4xf32>
    %c5 = arith.constant 5 : index
    %c0_50 = arith.constant 0 : index
    %c0_51 = arith.constant 0 : index
    %37 = vector.load %arg3[%c5, %c0_50, %c0_51] : memref<9x4x4xf32, #tpu.memory_space<vmem>>, vector<1x4x4xf32>
    %38 = vector.shape_cast %37 : vector<1x4x4xf32> to vector<4x4xf32>
    %cst_52 = arith.constant dense<0.000000e+00> : vector<64x4xf32>
    %39 = tpu.matmul %36, %38, %cst_52 {dimension_numbers = #tpu.dot_dimension_numbers<[1], [0], [0], [1], [0, 0, 1, 1], [], []>} : vector<64x4xf32>, vector<4x4xf32>, vector<64x4xf32> -> vector<64x4xf32>
    %40 = arith.addf %33, %39 : vector<64x4xf32>
    %c0_53 = arith.constant 0 : index
    %c0_54 = arith.constant 0 : index
    %c0_55 = arith.constant 0 : index
    %c1_56 = arith.constant 1 : index
    %c0_57 = arith.constant 0 : index
    %c0_58 = arith.constant 0 : index
    %41 = vector.load %arg2[%c0_53, %c0_54, %c0_55, %c1_56, %c0_57, %c0_58] : memref<1x1x4x9x9x4xf32, #tpu.memory_space<vmem>>, vector<1x1x1x8x8x4xf32>
    %42 = vector.shape_cast %41 : vector<1x1x1x8x8x4xf32> to vector<8x8x4xf32>
    %43 = vector.shape_cast %42 : vector<8x8x4xf32> to vector<64x4xf32>
    %c6 = arith.constant 6 : index
    %c0_59 = arith.constant 0 : index
    %c0_60 = arith.constant 0 : index
    %44 = vector.load %arg3[%c6, %c0_59, %c0_60] : memref<9x4x4xf32, #tpu.memory_space<vmem>>, vector<1x4x4xf32>
    %45 = vector.shape_cast %44 : vector<1x4x4xf32> to vector<4x4xf32>
    %cst_61 = arith.constant dense<0.000000e+00> : vector<64x4xf32>
    %46 = tpu.matmul %43, %45, %cst_61 {dimension_numbers = #tpu.dot_dimension_numbers<[1], [0], [0], [1], [0, 0, 1, 1], [], []>} : vector<64x4xf32>, vector<4x4xf32>, vector<64x4xf32> -> vector<64x4xf32>
    %47 = arith.addf %40, %46 : vector<64x4xf32>
    %c0_62 = arith.constant 0 : index
    %c0_63 = arith.constant 0 : index
    %c1_64 = arith.constant 1 : index
    %c1_65 = arith.constant 1 : index
    %c0_66 = arith.constant 0 : index
    %c0_67 = arith.constant 0 : index
    %48 = vector.load %arg2[%c0_62, %c0_63, %c1_64, %c1_65, %c0_66, %c0_67] : memref<1x1x4x9x9x4xf32, #tpu.memory_space<vmem>>, vector<1x1x1x8x8x4xf32>
    %49 = vector.shape_cast %48 : vector<1x1x1x8x8x4xf32> to vector<8x8x4xf32>
    %50 = vector.shape_cast %49 : vector<8x8x4xf32> to vector<64x4xf32>
    %c7 = arith.constant 7 : index
    %c0_68 = arith.constant 0 : index
    %c0_69 = arith.constant 0 : index
    %51 = vector.load %arg3[%c7, %c0_68, %c0_69] : memref<9x4x4xf32, #tpu.memory_space<vmem>>, vector<1x4x4xf32>
    %52 = vector.shape_cast %51 : vector<1x4x4xf32> to vector<4x4xf32>
    %cst_70 = arith.constant dense<0.000000e+00> : vector<64x4xf32>
    %53 = tpu.matmul %50, %52, %cst_70 {dimension_numbers = #tpu.dot_dimension_numbers<[1], [0], [0], [1], [0, 0, 1, 1], [], []>} : vector<64x4xf32>, vector<4x4xf32>, vector<64x4xf32> -> vector<64x4xf32>
    %54 = arith.addf %47, %53 : vector<64x4xf32>
    %c0_71 = arith.constant 0 : index
    %c0_72 = arith.constant 0 : index
    %c0_73 = arith.constant 0 : index
    %c1_74 = arith.constant 1 : index
    %c1_75 = arith.constant 1 : index
    %c0_76 = arith.constant 0 : index
    %55 = vector.load %arg2[%c0_71, %c0_72, %c0_73, %c1_74, %c1_75, %c0_76] : memref<1x1x4x9x9x4xf32, #tpu.memory_space<vmem>>, vector<1x1x1x8x8x4xf32>
    %56 = vector.shape_cast %55 : vector<1x1x1x8x8x4xf32> to vector<8x8x4xf32>
    %57 = vector.shape_cast %56 : vector<8x8x4xf32> to vector<64x4xf32>
    %c8 = arith.constant 8 : index
    %c0_77 = arith.constant 0 : index
    %c0_78 = arith.constant 0 : index
    %58 = vector.load %arg3[%c8, %c0_77, %c0_78] : memref<9x4x4xf32, #tpu.memory_space<vmem>>, vector<1x4x4xf32>
    %59 = vector.shape_cast %58 : vector<1x4x4xf32> to vector<4x4xf32>
    %cst_79 = arith.constant dense<0.000000e+00> : vector<64x4xf32>
    %60 = tpu.matmul %57, %59, %cst_79 {dimension_numbers = #tpu.dot_dimension_numbers<[1], [0], [0], [1], [0, 0, 1, 1], [], []>} : vector<64x4xf32>, vector<4x4xf32>, vector<64x4xf32> -> vector<64x4xf32>
    %61 = arith.addf %54, %60 : vector<64x4xf32>
    %c0_80 = arith.constant 0 : index
    %c0_81 = arith.constant 0 : index
    %c0_82 = arith.constant 0 : index
    %62 = vector.load %arg4[%c0_80, %c0_81, %c0_82] : memref<1x1x64xf32, #tpu.memory_space<vmem>>, vector<1x1x64xf32>
    %63 = vector.shape_cast %62 : vector<1x1x64xf32> to vector<1x64xf32>
    %cst_83 = arith.constant dense<0.000000e+00> : vector<1x4xf32>
    %64 = tpu.matmul %63, %61, %cst_83 {dimension_numbers = #tpu.dot_dimension_numbers<[1], [0], [0], [1], [0, 0, 1, 1], [], []>} : vector<1x64xf32>, vector<64x4xf32>, vector<1x4xf32> -> vector<1x4xf32>
    %c0_84 = arith.constant 0 : index
    %c0_85 = arith.constant 0 : index
    %c0_86 = arith.constant 0 : index
    %c0_87 = arith.constant 0 : index
    %65 = vector.load %arg5[%c0_84, %c0_85, %c0_86, %c0_87] : memref<1x1x2x4xf32, #tpu.memory_space<vmem>>, vector<1x1x1x4xf32>
    %66 = vector.shape_cast %65 : vector<1x1x1x4xf32> to vector<1x4xf32>
    %67 = vector.shape_cast %64 : vector<1x4xf32> to vector<1x1x1x4xf32>
    tpu.vector_store %arg5[%c0_84, %c0_85, %c0_86, %c0_87], %67 {strides = array<i32>} : memref<1x1x2x4xf32, #tpu.memory_space<vmem>>, vector<1x1x1x4xf32>,
    %68 = arith.mulf %61, %61 : vector<64x4xf32>
    %cst_88 = arith.constant dense<0.000000e+00> : vector<1x4xf32>
    %69 = tpu.matmul %63, %68, %cst_88 {dimension_numbers = #tpu.dot_dimension_numbers<[1], [0], [0], [1], [0, 0, 1, 1], [], []>} : vector<1x64xf32>, vector<64x4xf32>, vector<1x4xf32> -> vector<1x4xf32>
    %c0_89 = arith.constant 0 : index
    %c0_90 = arith.constant 0 : index
    %c1_91 = arith.constant 1 : index
    %c0_92 = arith.constant 0 : index
    %70 = vector.load %arg5[%c0_89, %c0_90, %c1_91, %c0_92] : memref<1x1x2x4xf32, #tpu.memory_space<vmem>>, vector<1x1x1x4xf32>
    %71 = vector.shape_cast %70 : vector<1x1x1x4xf32> to vector<1x4xf32>
    %72 = vector.shape_cast %69 : vector<1x4xf32> to vector<1x1x1x4xf32>
    tpu.vector_store %arg5[%c0_89, %c0_90, %c1_91, %c0_92], %72 {strides = array<i32>} : memref<1x1x2x4xf32, #tpu.memory_space<vmem>>, vector<1x1x1x4xf32>,
    return
  }
  func.func @transform_0(%arg0: i32, %arg1: i32) -> (i32, i32, i32, i32, i32, i32) {
    %c0_i32 = arith.constant 0 : i32
    %c0_i32_0 = arith.constant 0 : i32
    %c0_i32_1 = arith.constant 0 : i32
    %c0_i32_2 = arith.constant 0 : i32
    %c0_i32_3 = arith.constant 0 : i32
    return %arg0, %arg1, %c0_i32, %c0_i32_0, %c0_i32_1, %c0_i32_2 : i32, i32, i32, i32, i32, i32
  }
  func.func @transform_1(%arg0: i32, %arg1: i32) -> (i32, i32, i32) {
    %c0_i32 = arith.constant 0 : i32
    %c0_i32_0 = arith.constant 0 : i32
    %c0_i32_1 = arith.constant 0 : i32
    %c0_i32_2 = arith.constant 0 : i32
    return %c0_i32, %c0_i32_0, %c0_i32_1 : i32, i32, i32
  }
  func.func @transform_2(%arg0: i32, %arg1: i32) -> (i32, i32, i32) {
    %c0_i32 = arith.constant 0 : i32
    %c0_i32_0 = arith.constant 0 : i32
    %c0_i32_1 = arith.constant 0 : i32
    return %arg1, %c0_i32, %c0_i32_0 : i32, i32, i32
  }
  func.func @transform_3(%arg0: i32, %arg1: i32) -> (i32, i32, i32, i32) {
    %c0_i32 = arith.constant 0 : i32
    %c0_i32_0 = arith.constant 0 : i32
    %c0_i32_1 = arith.constant 0 : i32
    return %arg0, %arg1, %c0_i32, %c0_i32_0 : i32, i32, i32, i32
  }
}

module attributes {stable_mosaic.version = 11 : i64} {
  func.func @_fwd_kernel(%arg0: i32, %arg1: i32, %arg2: memref<1x1x4x9x9x4xf32, #tpu.memory_space<vmem>>, %arg3: memref<9x4x4xf32, #tpu.memory_space<vmem>>, %arg4: memref<1x4xf32, #tpu.memory_space<vmem>>, %arg5: memref<1x4xf32, #tpu.memory_space<vmem>>, %arg6: memref<1x1x64x4xf32, #tpu.memory_space<vmem>>) attributes {dimension_semantics = [#tpu.dimension_semantics<parallel>, #tpu.dimension_semantics<parallel>], iteration_bounds = array<i64: 2, 1>, scalar_prefetch = 0 : i64, scratch_operands = 0 : i64, tpu.core_type = #tpu.core_type<tc>, window_params = [{transform_indices = @transform_0, window_bounds = array<i64: 1, 1, 4, 9, 9, 4>}, {pipeline_mode = #tpu.pipeline_mode<synchronous>, transform_indices = @transform_1, window_bounds = array<i64: 9, 4, 4>}, {pipeline_mode = #tpu.pipeline_mode<synchronous>, transform_indices = @transform_2, window_bounds = array<i64: 1, 4>}, {pipeline_mode = #tpu.pipeline_mode<synchronous>, transform_indices = @transform_3, window_bounds = array<i64: 1, 4>}, {transform_indices = @transform_4, window_bounds = array<i64: 1, 1, 64, 4>}]} {
    %c0 = arith.constant 0 : index
    %c0_0 = arith.constant 0 : index
    %c0_1 = arith.constant 0 : index
    %c0_2 = arith.constant 0 : index
    %c0_3 = arith.constant 0 : index
    %c0_4 = arith.constant 0 : index
    %0 = vector.load %arg2[%c0, %c0_0, %c0_1, %c0_2, %c0_3, %c0_4] : memref<1x1x4x9x9x4xf32, #tpu.memory_space<vmem>>, vector<1x1x1x8x8x4xf32>
    %1 = vector.shape_cast %0 : vector<1x1x1x8x8x4xf32> to vector<8x8x4xf32>
    %2 = vector.shape_cast %1 : vector<8x8x4xf32> to vector<64x4xf32>
    %c0_5 = arith.constant 0 : index
    %c0_6 = arith.constant 0 : index
    %c0_7 = arith.constant 0 : index
    %3 = vector.load %arg3[%c0_5, %c0_6, %c0_7] : memref<9x4x4xf32, #tpu.memory_space<vmem>>, vector<1x4x4xf32>
    %4 = vector.shape_cast %3 : vector<1x4x4xf32> to vector<4x4xf32>
    %cst = arith.constant dense<0.000000e+00> : vector<64x4xf32>
    %5 = tpu.matmul %2, %4, %cst {dimension_numbers = #tpu.dot_dimension_numbers<[1], [0], [0], [1], [0, 0, 1, 1], [], []>} : vector<64x4xf32>, vector<4x4xf32>, vector<64x4xf32> -> vector<64x4xf32>
    %c0_8 = arith.constant 0 : index
    %c0_9 = arith.constant 0 : index
    %c1 = arith.constant 1 : index
    %c0_10 = arith.constant 0 : index
    %c0_11 = arith.constant 0 : index
    %c0_12 = arith.constant 0 : index
    %6 = vector.load %arg2[%c0_8, %c0_9, %c1, %c0_10, %c0_11, %c0_12] : memref<1x1x4x9x9x4xf32, #tpu.memory_space<vmem>>, vector<1x1x1x8x8x4xf32>
    %7 = vector.shape_cast %6 : vector<1x1x1x8x8x4xf32> to vector<8x8x4xf32>
    %8 = vector.shape_cast %7 : vector<8x8x4xf32> to vector<64x4xf32>
    %c1_13 = arith.constant 1 : index
    %c0_14 = arith.constant 0 : index
    %c0_15 = arith.constant 0 : index
    %9 = vector.load %arg3[%c1_13, %c0_14, %c0_15] : memref<9x4x4xf32, #tpu.memory_space<vmem>>, vector<1x4x4xf32>
    %10 = vector.shape_cast %9 : vector<1x4x4xf32> to vector<4x4xf32>
    %cst_16 = arith.constant dense<0.000000e+00> : vector<64x4xf32>
    %11 = tpu.matmul %8, %10, %cst_16 {dimension_numbers = #tpu.dot_dimension_numbers<[1], [0], [0], [1], [0, 0, 1, 1], [], []>} : vector<64x4xf32>, vector<4x4xf32>, vector<64x4xf32> -> vector<64x4xf32>
    %12 = arith.addf %5, %11 : vector<64x4xf32>
    %c0_17 = arith.constant 0 : index
    %c0_18 = arith.constant 0 : index
    %c0_19 = arith.constant 0 : index
    %c0_20 = arith.constant 0 : index
    %c1_21 = arith.constant 1 : index
    %c0_22 = arith.constant 0 : index
    %13 = vector.load %arg2[%c0_17, %c0_18, %c0_19, %c0_20, %c1_21, %c0_22] : memref<1x1x4x9x9x4xf32, #tpu.memory_space<vmem>>, vector<1x1x1x8x8x4xf32>
    %14 = vector.shape_cast %13 : vector<1x1x1x8x8x4xf32> to vector<8x8x4xf32>
    %15 = vector.shape_cast %14 : vector<8x8x4xf32> to vector<64x4xf32>
    %c2 = arith.constant 2 : index
    %c0_23 = arith.constant 0 : index
    %c0_24 = arith.constant 0 : index
    %16 = vector.load %arg3[%c2, %c0_23, %c0_24] : memref<9x4x4xf32, #tpu.memory_space<vmem>>, vector<1x4x4xf32>
    %17 = vector.shape_cast %16 : vector<1x4x4xf32> to vector<4x4xf32>
    %cst_25 = arith.constant dense<0.000000e+00> : vector<64x4xf32>
    %18 = tpu.matmul %15, %17, %cst_25 {dimension_numbers = #tpu.dot_dimension_numbers<[1], [0], [0], [1], [0, 0, 1, 1], [], []>} : vector<64x4xf32>, vector<4x4xf32>, vector<64x4xf32> -> vector<64x4xf32>
    %19 = arith.addf %12, %18 : vector<64x4xf32>
    %c0_26 = arith.constant 0 : index
    %c0_27 = arith.constant 0 : index
    %c2_28 = arith.constant 2 : index
    %c0_29 = arith.constant 0 : index
    %c0_30 = arith.constant 0 : index
    %c0_31 = arith.constant 0 : index
    %20 = vector.load %arg2[%c0_26, %c0_27, %c2_28, %c0_29, %c0_30, %c0_31] : memref<1x1x4x9x9x4xf32, #tpu.memory_space<vmem>>, vector<1x1x1x8x8x4xf32>
    %21 = vector.shape_cast %20 : vector<1x1x1x8x8x4xf32> to vector<8x8x4xf32>
    %22 = vector.shape_cast %21 : vector<8x8x4xf32> to vector<64x4xf32>
    %c3 = arith.constant 3 : index
    %c0_32 = arith.constant 0 : index
    %c0_33 = arith.constant 0 : index
    %23 = vector.load %arg3[%c3, %c0_32, %c0_33] : memref<9x4x4xf32, #tpu.memory_space<vmem>>, vector<1x4x4xf32>
    %24 = vector.shape_cast %23 : vector<1x4x4xf32> to vector<4x4xf32>
    %cst_34 = arith.constant dense<0.000000e+00> : vector<64x4xf32>
    %25 = tpu.matmul %22, %24, %cst_34 {dimension_numbers = #tpu.dot_dimension_numbers<[1], [0], [0], [1], [0, 0, 1, 1], [], []>} : vector<64x4xf32>, vector<4x4xf32>, vector<64x4xf32> -> vector<64x4xf32>
    %26 = arith.addf %19, %25 : vector<64x4xf32>
    %c0_35 = arith.constant 0 : index
    %c0_36 = arith.constant 0 : index
    %c3_37 = arith.constant 3 : index
    %c0_38 = arith.constant 0 : index
    %c0_39 = arith.constant 0 : index
    %c0_40 = arith.constant 0 : index
    %27 = vector.load %arg2[%c0_35, %c0_36, %c3_37, %c0_38, %c0_39, %c0_40] : memref<1x1x4x9x9x4xf32, #tpu.memory_space<vmem>>, vector<1x1x1x8x8x4xf32>
    %28 = vector.shape_cast %27 : vector<1x1x1x8x8x4xf32> to vector<8x8x4xf32>
    %29 = vector.shape_cast %28 : vector<8x8x4xf32> to vector<64x4xf32>
    %c4 = arith.constant 4 : index
    %c0_41 = arith.constant 0 : index
    %c0_42 = arith.constant 0 : index
    %30 = vector.load %arg3[%c4, %c0_41, %c0_42] : memref<9x4x4xf32, #tpu.memory_space<vmem>>, vector<1x4x4xf32>
    %31 = vector.shape_cast %30 : vector<1x4x4xf32> to vector<4x4xf32>
    %cst_43 = arith.constant dense<0.000000e+00> : vector<64x4xf32>
    %32 = tpu.matmul %29, %31, %cst_43 {dimension_numbers = #tpu.dot_dimension_numbers<[1], [0], [0], [1], [0, 0, 1, 1], [], []>} : vector<64x4xf32>, vector<4x4xf32>, vector<64x4xf32> -> vector<64x4xf32>
    %33 = arith.addf %26, %32 : vector<64x4xf32>
    %c0_44 = arith.constant 0 : index
    %c0_45 = arith.constant 0 : index
    %c2_46 = arith.constant 2 : index
    %c0_47 = arith.constant 0 : index
    %c1_48 = arith.constant 1 : index
    %c0_49 = arith.constant 0 : index
    %34 = vector.load %arg2[%c0_44, %c0_45, %c2_46, %c0_47, %c1_48, %c0_49] : memref<1x1x4x9x9x4xf32, #tpu.memory_space<vmem>>, vector<1x1x1x8x8x4xf32>
    %35 = vector.shape_cast %34 : vector<1x1x1x8x8x4xf32> to vector<8x8x4xf32>
    %36 = vector.shape_cast %35 : vector<8x8x4xf32> to vector<64x4xf32>
    %c5 = arith.constant 5 : index
    %c0_50 = arith.constant 0 : index
    %c0_51 = arith.constant 0 : index
    %37 = vector.load %arg3[%c5, %c0_50, %c0_51] : memref<9x4x4xf32, #tpu.memory_space<vmem>>, vector<1x4x4xf32>
    %38 = vector.shape_cast %37 : vector<1x4x4xf32> to vector<4x4xf32>
    %cst_52 = arith.constant dense<0.000000e+00> : vector<64x4xf32>
    %39 = tpu.matmul %36, %38, %cst_52 {dimension_numbers = #tpu.dot_dimension_numbers<[1], [0], [0], [1], [0, 0, 1, 1], [], []>} : vector<64x4xf32>, vector<4x4xf32>, vector<64x4xf32> -> vector<64x4xf32>
    %40 = arith.addf %33, %39 : vector<64x4xf32>
    %c0_53 = arith.constant 0 : index
    %c0_54 = arith.constant 0 : index
    %c0_55 = arith.constant 0 : index
    %c1_56 = arith.constant 1 : index
    %c0_57 = arith.constant 0 : index
    %c0_58 = arith.constant 0 : index
    %41 = vector.load %arg2[%c0_53, %c0_54, %c0_55, %c1_56, %c0_57, %c0_58] : memref<1x1x4x9x9x4xf32, #tpu.memory_space<vmem>>, vector<1x1x1x8x8x4xf32>
    %42 = vector.shape_cast %41 : vector<1x1x1x8x8x4xf32> to vector<8x8x4xf32>
    %43 = vector.shape_cast %42 : vector<8x8x4xf32> to vector<64x4xf32>
    %c6 = arith.constant 6 : index
    %c0_59 = arith.constant 0 : index
    %c0_60 = arith.constant 0 : index
    %44 = vector.load %arg3[%c6, %c0_59, %c0_60] : memref<9x4x4xf32, #tpu.memory_space<vmem>>, vector<1x4x4xf32>
    %45 = vector.shape_cast %44 : vector<1x4x4xf32> to vector<4x4xf32>
    %cst_61 = arith.constant dense<0.000000e+00> : vector<64x4xf32>
    %46 = tpu.matmul %43, %45, %cst_61 {dimension_numbers = #tpu.dot_dimension_numbers<[1], [0], [0], [1], [0, 0, 1, 1], [], []>} : vector<64x4xf32>, vector<4x4xf32>, vector<64x4xf32> -> vector<64x4xf32>
    %47 = arith.addf %40, %46 : vector<64x4xf32>
    %c0_62 = arith.constant 0 : index
    %c0_63 = arith.constant 0 : index
    %c1_64 = arith.constant 1 : index
    %c1_65 = arith.constant 1 : index
    %c0_66 = arith.constant 0 : index
    %c0_67 = arith.constant 0 : index
    %48 = vector.load %arg2[%c0_62, %c0_63, %c1_64, %c1_65, %c0_66, %c0_67] : memref<1x1x4x9x9x4xf32, #tpu.memory_space<vmem>>, vector<1x1x1x8x8x4xf32>
    %49 = vector.shape_cast %48 : vector<1x1x1x8x8x4xf32> to vector<8x8x4xf32>
    %50 = vector.shape_cast %49 : vector<8x8x4xf32> to vector<64x4xf32>
    %c7 = arith.constant 7 : index
    %c0_68 = arith.constant 0 : index
    %c0_69 = arith.constant 0 : index
    %51 = vector.load %arg3[%c7, %c0_68, %c0_69] : memref<9x4x4xf32, #tpu.memory_space<vmem>>, vector<1x4x4xf32>
    %52 = vector.shape_cast %51 : vector<1x4x4xf32> to vector<4x4xf32>
    %cst_70 = arith.constant dense<0.000000e+00> : vector<64x4xf32>
    %53 = tpu.matmul %50, %52, %cst_70 {dimension_numbers = #tpu.dot_dimension_numbers<[1], [0], [0], [1], [0, 0, 1, 1], [], []>} : vector<64x4xf32>, vector<4x4xf32>, vector<64x4xf32> -> vector<64x4xf32>
    %54 = arith.addf %47, %53 : vector<64x4xf32>
    %c0_71 = arith.constant 0 : index
    %c0_72 = arith.constant 0 : index
    %c0_73 = arith.constant 0 : index
    %c1_74 = arith.constant 1 : index
    %c1_75 = arith.constant 1 : index
    %c0_76 = arith.constant 0 : index
    %55 = vector.load %arg2[%c0_71, %c0_72, %c0_73, %c1_74, %c1_75, %c0_76] : memref<1x1x4x9x9x4xf32, #tpu.memory_space<vmem>>, vector<1x1x1x8x8x4xf32>
    %56 = vector.shape_cast %55 : vector<1x1x1x8x8x4xf32> to vector<8x8x4xf32>
    %57 = vector.shape_cast %56 : vector<8x8x4xf32> to vector<64x4xf32>
    %c8 = arith.constant 8 : index
    %c0_77 = arith.constant 0 : index
    %c0_78 = arith.constant 0 : index
    %58 = vector.load %arg3[%c8, %c0_77, %c0_78] : memref<9x4x4xf32, #tpu.memory_space<vmem>>, vector<1x4x4xf32>
    %59 = vector.shape_cast %58 : vector<1x4x4xf32> to vector<4x4xf32>
    %cst_79 = arith.constant dense<0.000000e+00> : vector<64x4xf32>
    %60 = tpu.matmul %57, %59, %cst_79 {dimension_numbers = #tpu.dot_dimension_numbers<[1], [0], [0], [1], [0, 0, 1, 1], [], []>} : vector<64x4xf32>, vector<4x4xf32>, vector<64x4xf32> -> vector<64x4xf32>
    %61 = arith.addf %54, %60 : vector<64x4xf32>
    %c0_80 = arith.constant 0 : index
    %c0_81 = arith.constant 0 : index
    %62 = vector.load %arg4[%c0_80, %c0_81] : memref<1x4xf32, #tpu.memory_space<vmem>>, vector<1x4xf32>
    %63 = vector.broadcast %62 : vector<1x4xf32> to vector<64x4xf32>
    %64 = arith.mulf %61, %63 : vector<64x4xf32>
    %c0_82 = arith.constant 0 : index
    %c0_83 = arith.constant 0 : index
    %65 = vector.load %arg5[%c0_82, %c0_83] : memref<1x4xf32, #tpu.memory_space<vmem>>, vector<1x4xf32>
    %66 = vector.broadcast %65 : vector<1x4xf32> to vector<64x4xf32>
    %67 = arith.addf %64, %66 : vector<64x4xf32>
    %cst_84 = arith.constant 0.00999999977 : f32
    %68 = vector.broadcast %cst_84 : f32 to vector<64x4xf32>
    %69 = arith.mulf %68, %67 : vector<64x4xf32>
    %70 = arith.maximumf %67, %69 : vector<64x4xf32>
    %c0_85 = arith.constant 0 : index
    %c0_86 = arith.constant 0 : index
    %c0_87 = arith.constant 0 : index
    %c0_88 = arith.constant 0 : index
    %71 = vector.load %arg6[%c0_85, %c0_86, %c0_87, %c0_88] : memref<1x1x64x4xf32, #tpu.memory_space<vmem>>, vector<1x1x64x4xf32>
    %72 = vector.shape_cast %71 : vector<1x1x64x4xf32> to vector<64x4xf32>
    %73 = vector.shape_cast %70 : vector<64x4xf32> to vector<1x1x64x4xf32>
    tpu.vector_store %arg6[%c0_85, %c0_86, %c0_87, %c0_88], %73 {strides = array<i32>} : memref<1x1x64x4xf32, #tpu.memory_space<vmem>>, vector<1x1x64x4xf32>,
    return
  }
  func.func @transform_0(%arg0: i32, %arg1: i32) -> (i32, i32, i32, i32, i32, i32) {
    %c0_i32 = arith.constant 0 : i32
    %c0_i32_0 = arith.constant 0 : i32
    %c0_i32_1 = arith.constant 0 : i32
    %c0_i32_2 = arith.constant 0 : i32
    %c0_i32_3 = arith.constant 0 : i32
    return %arg0, %arg1, %c0_i32, %c0_i32_0, %c0_i32_1, %c0_i32_2 : i32, i32, i32, i32, i32, i32
  }
  func.func @transform_1(%arg0: i32, %arg1: i32) -> (i32, i32, i32) {
    %c0_i32 = arith.constant 0 : i32
    %c0_i32_0 = arith.constant 0 : i32
    %c0_i32_1 = arith.constant 0 : i32
    %c0_i32_2 = arith.constant 0 : i32
    return %c0_i32, %c0_i32_0, %c0_i32_1 : i32, i32, i32
  }
  func.func @transform_2(%arg0: i32, %arg1: i32) -> (i32, i32) {
    %c0_i32 = arith.constant 0 : i32
    %c0_i32_0 = arith.constant 0 : i32
    %c0_i32_1 = arith.constant 0 : i32
    return %c0_i32, %c0_i32_0 : i32, i32
  }
  func.func @transform_3(%arg0: i32, %arg1: i32) -> (i32, i32) {
    %c0_i32 = arith.constant 0 : i32
    %c0_i32_0 = arith.constant 0 : i32
    %c0_i32_1 = arith.constant 0 : i32
    return %c0_i32, %c0_i32_0 : i32, i32
  }
  func.func @transform_4(%arg0: i32, %arg1: i32) -> (i32, i32, i32, i32) {
    %c0_i32 = arith.constant 0 : i32
    %c0_i32_0 = arith.constant 0 : i32
    %c0_i32_1 = arith.constant 0 : i32
    return %arg0, %arg1, %c0_i32, %c0_i32_0 : i32, i32, i32, i32
  }
}

</mosaic_0001>

<bundles_post_ra>
// kernel: downsample.2
= control target key start
LH: loop header
LB: loop body
LE: loop exit
PB: predicated region body
PF: predicated region fallthrough
CT: control target
= control target key end

     0   :  { %s2389_s12 = smov 0   ;;  %s2391_s13 = smov 0   ;;  %s2629_s0 = inlined_call_operand.vmem [shape: f32[2,1,4,9,9,4], index: 0, kind: input, shape index: {}]   ;;  %s2630_s1 = inlined_call_operand.vmem [shape: f32[9,4,4], index: 1, kind: input, shape index: {}]   ;;  %s2631_s2 = inlined_call_operand.vmem [shape: f32[1,1,64], index: 2, kind: input, shape index: {}]   ;;  %s2632_s3 = inlined_call_operand.vmem [shape: f32[2,1,2,4], index: 3, kind: output, shape index: {}]  }
   0x1   :  { %s2393_s14 = smov 0  }
   0x2 LB: > { %s25_s15 = sadd.s32 1, %s2360_s13  ;;  %p1811_p0 = scmp.ge.s32.totalorder %s2364_s14, 1  ;;  %s2364_s14 = sphi %s2393_s14, %s13_s14   ;;  %s2360_s13 = sphi %s2391_s13, %s2634_s13   ;;  %s2356_s12 = sphi %s2389_s12, %s2633_s12  }
   0x3   : > { %p27_p1 = scmp.ge.s32.totalorder %s25_s15, 2  ;;  %p165_p2 = scmp.lt.s32.totalorder %s2364_s14, 3 }
   0x5   : > { %s2636_s15 = smov (%p27_p1, %s25_s15), 0  ;;  %p166_p3 = pnand %p1811_p0, %p165_p2 }
   0x6   : > { %vm262_vm0 = vcmask (!%p166_p3), 1043456   ;;  %v1877_v0 = vld [vmem:[%s2630_s1 + $0x10] sm:$0xf] (!%p166_p3)  ;;  %v1822_v1 = vld [vmem:[%s2630_s1 + $0x4] sm:$0xf] (!%p166_p3)  ;;  %p198_p4 = scmp.lt.s32.totalorder (!%p166_p3), %s2356_s12, 1 }
   0x7   : > { %169 = sbr.rel (%p166_p3) target bundleno = 546 (0x222), region = 32  ;;  %2118 = vmatprep.subr.msk.mxu0 (!%p166_p3), %vm262_vm0, %v1877_v0  ;;  %2062 = vmatprep.subr.msk.mxu1 (!%p166_p3), %vm262_vm0, %v1822_v1  ;;  %v1895_v2 = vld [vmem:[%s2630_s1 + $0x14] sm:$0xf] (!%p166_p3)  ;;  %v225_v3 = vld [vmem:[%s2630_s1] sm:$0xf] (!%p166_p3)  ;;  %vm237_vm1 = vcmask (!%p166_p3), 31744  }
   0x8   : > { %2119 = vmatpush3.msk.msra.mxu0 (!%p166_p3), %vm262_vm0, %v1877_v0  ;;  %2063 = vmatpush3.msk.msra.mxu1 (!%p166_p3), %vm262_vm0, %v1822_v1  ;;  %v1913_v10 = vld [vmem:[%s2630_s1 + $0x18] sm:$0xf] (!%p166_p3)  ;;  %v1841_v11 = vld [vmem:[%s2630_s1 + $0x8] sm:$0xf] (!%p166_p3)  ;;  %v1931_v28 = vld [vmem:[%s2630_s1 + $0x1c] sm:$0xf] (!%p166_p3) }
   0x9   : > { %2132 = vmatprep.subr.msk.mxu0 (!%p166_p3), %vm262_vm0, %v1895_v2  ;;  %2076 = vmatprep.subr.msk.mxu1 (!%p166_p3), %vm262_vm0, %v225_v3  ;;  %v1859_v29 = vld [vmem:[%s2630_s1 + $0xc] sm:$0xf] (!%p166_p3)  ;;  %v1949_v43 = vld [vmem:[%s2630_s1 + $0x20] sm:$0xf] (!%p166_p3)  ;;  %v2366_v60 = vmov (!%p166_p3), 0.0|0.0   ;;  %vm2367_vm2 = vmmov (!%p166_p3), 0  }
   0xa   : > { %v2368_v61 = vmov (!%p166_p3), 0.0   ;;  %vm1558_vm3 = vcmask (!%p166_p3), 523264   ;;  %vm1632_vm4 = vcmask (!%p166_p3), 24576  }
   0xe   : > { %s2638_s12 = smov (!%p198_p4, %s2356_s12), 1 }
   0xf   : > { %s2314_s24 = smul.u32 576, %s2638_s12  ;;  %s1813_s17 = sshll.u32 %s2638_s12, 1 }
  0x10   : > { %s216_s20 = scalar_lea.vmem %s2632_s3, %s1813_s17 }
  0x11   : > { %s2431_s27 = scalar_lea.vmem %s2629_s0, %s2314_s24 }
  0x12   : > { %v1814_v4 = vld [vmem:[%s2431_s27 + $0x90] sm:$0xff]  ;;  %v2436_v6 = vld [vmem:[%s2431_s27 + $0xa0] sm:$0xff] }
  0x13   : > { %v1869_v5 = vld [vmem:[%s2431_s27 + $0x1b0] sm:$0xff]  ;;  %2064 = vmatprep.mubr.msk.f32.mxu1 %vm237_vm1, %v1814_v4  ;;  %v1870_v7 = vld [vmem:[%s2431_s27 + $0x1c0] sm:$0xff] }
  0x14   : > { %2120 = vmatprep.mubr.msk.f32.mxu0 %vm237_vm1, %v1869_v5  ;;  %v2442_v8 = vld [vmem:[%s2431_s27 + $0xb0] sm:$0xff]  ;;  %2065 = vmatmul.mubr.msk.f32.vlgmr.msra.gmra.mrb[0].mxu1 %vm237_vm1, %v2436_v6  ;;  %v2458_v12 = vld [vmem:[%s2431_s27 + $0xc0] sm:$0xff] }
  0x15   : > { %v1871_v9 = vld [vmem:[%s2431_s27 + $0x1d0] sm:$0xff]  ;;  %2121 = vmatmul.mubr.msk.f32.vlgmr.msra.gmra.mrb[0].mxu0 %vm237_vm1, %v1870_v7  ;;  %2067 = vmatprep.mubr.msk.f32.mxu1 %vm237_vm1, %v2442_v8  ;;  %v1872_v13 = vld [vmem:[%s2431_s27 + $0x1e0] sm:$0xff] }
  0x16   : > { %2133 = vmatpush3.msk.msra.mxu0 %vm262_vm0, %v1895_v2  ;;  %2123 = vmatprep.mubr.msk.f32.mxu0 %vm237_vm1, %v1871_v9  ;;  %v2463_v14 = vld [vmem:[%s2431_s27 + $0xd0] sm:$0xff]  ;;  %v2476_v16 = vld [vmem:[%s2431_s27 + $0xe0] sm:$0xff] }
  0x17   : > { %v1873_v15 = vld [vmem:[%s2431_s27 + $0x1f0] sm:$0xff]  ;;  %2077 = vmatpush3.msk.msra.mxu1 %vm262_vm0, %v225_v3  ;;  %2146 = vmatprep.subr.msk.mxu0 %vm262_vm0, %v1913_v10  ;;  %v1874_v17 = vld [vmem:[%s2431_s27 + $0x200] sm:$0xff] }
  0x18   : > { %2090 = vmatprep.subr.msk.mxu1 %vm262_vm0, %v1841_v11  ;;  %2068 = vmatmul.mubr.msk.f32.gmra.mrb[2].mxu1 %vm237_vm1, %v2458_v12  ;;  %v2480_v18 = vld [vmem:[%s2431_s27 + $0xf0] sm:$0xff]  ;;  %v2490_v20 = vld [vmem:[%s2431_s27 + $0x100] sm:$0xff] }
  0x19   : > { %2124 = vmatmul.mubr.msk.f32.gmra.mrb[2].mxu0 %vm237_vm1, %v1872_v13  ;;  %2070 = vmatprep.mubr.msk.f32.mxu1 %vm237_vm1, %v2463_v14  ;;  %v1875_v19 = vld [vmem:[%s2431_s27 + $0x210] sm:$0xff]  ;;  %v1876_v21 = vld [vmem:[%s2431_s27 + $0x220] sm:$0xff] }
  0x1a   : > { %2126 = vmatprep.mubr.msk.f32.mxu0 %vm237_vm1, %v1873_v15  ;;  %v217_v22 = vld [vmem:[%s2431_s27] sm:$0xff]  ;;  %v218_v24 = vld [vmem:[%s2431_s27 + $0x10] sm:$0xff] }
  0x1b   : > { %v1887_v23 = vld [vmem:[%s2431_s27 + $0x121] sm:$0xff]  ;;  %v1888_v25 = vld [vmem:[%s2431_s27 + $0x131] sm:$0xff] }
  0x1c   : > { %2071 = vmatmul.mubr.msk.f32.gmra.mrb[4].mxu1 %vm237_vm1, %v2476_v16  ;;  %v219_v26 = vld [vmem:[%s2431_s27 + $0x20] sm:$0xff]  ;;  %v220_v30 = vld [vmem:[%s2431_s27 + $0x30] sm:$0xff] }
  0x1d   : > { %2127 = vmatmul.mubr.msk.f32.gmra.mrb[4].mxu0 %vm237_vm1, %v1874_v17  ;;  %2073 = vmatprep.mubr.msk.f32.mxu1 %vm237_vm1, %v2480_v18  ;;  %v1889_v27 = vld [vmem:[%s2431_s27 + $0x141] sm:$0xff]  ;;  %v1890_v31 = vld [vmem:[%s2431_s27 + $0x151] sm:$0xff] }
  0x1e   : > { %2129 = vmatprep.mubr.msk.f32.mxu0 %vm237_vm1, %v1875_v19  ;;  %v221_v32 = vld [vmem:[%s2431_s27 + $0x40] sm:$0xff]  ;;  %v222_v34 = vld [vmem:[%s2431_s27 + $0x50] sm:$0xff] }
  0x1f   : > { %v1891_v33 = vld [vmem:[%s2431_s27 + $0x161] sm:$0xff]  ;;  %v1892_v35 = vld [vmem:[%s2431_s27 + $0x171] sm:$0xff] }
  0x20   : > { %2074 = vmatmul.mubr.msk.f32.gmra.mrb[6].mxu1 %vm237_vm1, %v2490_v20  ;;  %v223_v36 = vld [vmem:[%s2431_s27 + $0x60] sm:$0xff]  ;;  %v224_v38 = vld [vmem:[%s2431_s27 + $0x70] sm:$0xff] }
  0x21   : > { %2130 = vmatmul.mubr.msk.f32.gmra.mrb[6].mxu0 %vm237_vm1, %v1876_v21  ;;  %2078 = vmatprep.mubr.msk.f32.mxu1 %vm237_vm1, %v217_v22  ;;  %v1893_v37 = vld [vmem:[%s2431_s27 + $0x181] sm:$0xff]  ;;  %v1894_v39 = vld [vmem:[%s2431_s27 + $0x191] sm:$0xff] }
  0x22   : > { %2134 = vmatprep.mubr.msk.f32.mxu0 %vm237_vm1, %v1887_v23  ;;  %v503_v40 = vld [vmem:[%s2431_s27 + $0x1] sm:$0xff]  ;;  %v504_v41 = vld [vmem:[%s2431_s27 + $0x11] sm:$0xff] }
  0x23   : > { %v505_v42 = vld [vmem:[%s2431_s27 + $0x21] sm:$0xff]  ;;  %v506_v44 = vld [vmem:[%s2431_s27 + $0x31] sm:$0xff] }
  0x24   : > { %2079 = vmatmul.mubr.msk.f32.vlgmr.msra.gmra.mrb[0].mxu1 %vm237_vm1, %v218_v24  ;;  %v507_v45 = vld [vmem:[%s2431_s27 + $0x41] sm:$0xff]  ;;  %v508_v46 = vld [vmem:[%s2431_s27 + $0x51] sm:$0xff] }
  0x25   : > { %2135 = vmatmul.mubr.msk.f32.vlgmr.msra.gmra.mrb[0].mxu0 %vm237_vm1, %v1888_v25  ;;  %2081 = vmatprep.mubr.msk.f32.mxu1 %vm237_vm1, %v219_v26  ;;  %v509_v47 = vld [vmem:[%s2431_s27 + $0x61] sm:$0xff]  ;;  %v510_v48 = vld [vmem:[%s2431_s27 + $0x71] sm:$0xff] }
  0x26   : > { %2147 = vmatpush3.msk.msra.mxu0 %vm262_vm0, %v1913_v10  ;;  %2137 = vmatprep.mubr.msk.f32.mxu0 %vm237_vm1, %v1889_v27  ;;  %v1912_v49 = vld [vmem:[%s2431_s27 + $0x80] sm:$0xff]  ;;  %v1852_v51 = vld [vmem:[%s2431_s27 + $0x130] sm:$0xff] }
  0x27   : > { %2091 = vmatpush3.msk.msra.mxu1 %vm262_vm0, %v1841_v11  ;;  %2160 = vmatprep.subr.msk.mxu0 %vm262_vm0, %v1931_v28  ;;  %v1851_v50 = vld [vmem:[%s2431_s27 + $0x120] sm:$0xff]  ;;  %v1854_v53 = vld [vmem:[%s2431_s27 + $0x150] sm:$0xff] }
  0x28   : > { %2104 = vmatprep.subr.msk.mxu1 %vm262_vm0, %v1859_v29  ;;  %2082 = vmatmul.mubr.msk.f32.gmra.mrb[2].mxu1 %vm237_vm1, %v220_v30  ;;  %v1853_v52 = vld [vmem:[%s2431_s27 + $0x140] sm:$0xff]  ;;  %v1856_v55 = vld [vmem:[%s2431_s27 + $0x170] sm:$0xff] }
  0x29   : > { %2138 = vmatmul.mubr.msk.f32.gmra.mrb[2].mxu0 %vm237_vm1, %v1890_v31  ;;  %2084 = vmatprep.mubr.msk.f32.mxu1 %vm237_vm1, %v221_v32  ;;  %v1855_v54 = vld [vmem:[%s2431_s27 + $0x160] sm:$0xff]  ;;  %v1858_v57 = vld [vmem:[%s2431_s27 + $0x190] sm:$0xff] }
  0x2a   : > { %2140 = vmatprep.mubr.msk.f32.mxu0 %vm237_vm1, %v1891_v33  ;;  %v1857_v56 = vld [vmem:[%s2431_s27 + $0x180] sm:$0xff]  ;;  %v1930_v58 = vld [vmem:[%s2431_s27 + $0x110] sm:$0xff] }
  0x2b   : > { %v1948_v59 = vld [vmem:[%s2431_s27 + $0x81] sm:$0xff] }
  0x2c   : > { %2085 = vmatmul.mubr.msk.f32.gmra.mrb[4].mxu1 %vm237_vm1, %v222_v34 }
  0x2d   : > { %2141 = vmatmul.mubr.msk.f32.gmra.mrb[4].mxu0 %vm237_vm1, %v1892_v35  ;;  %2087 = vmatprep.mubr.msk.f32.mxu1 %vm237_vm1, %v223_v36 }
  0x2e   : > { %2143 = vmatprep.mubr.msk.f32.mxu0 %vm237_vm1, %v1893_v37 }
  0x30   : > { %2088 = vmatmul.mubr.msk.f32.gmra.mrb[6].mxu1 %vm237_vm1, %v224_v38 }
  0x31   : > { %2144 = vmatmul.mubr.msk.f32.gmra.mrb[6].mxu0 %vm237_vm1, %v1894_v39  ;;  %2092 = vmatprep.mubr.msk.f32.mxu1 %vm237_vm1, %v503_v40 }
  0x32   : > { %2148 = vmatprep.mubr.msk.f32.mxu0 %vm237_vm1, %v218_v24 }
  0x34   : > { %2093 = vmatmul.mubr.msk.f32.vlgmr.msra.gmra.mrb[0].mxu1 %vm237_vm1, %v504_v41 }
  0x35   : > { %2149 = vmatmul.mubr.msk.f32.vlgmr.msra.gmra.mrb[0].mxu0 %vm237_vm1, %v219_v26  ;;  %2095 = vmatprep.mubr.msk.f32.mxu1 %vm237_vm1, %v505_v42 }
  0x36   : > { %2161 = vmatpush3.msk.msra.mxu0 %vm262_vm0, %v1931_v28  ;;  %2151 = vmatprep.mubr.msk.f32.mxu0 %vm237_vm1, %v220_v30 }
  0x37   : > { %2105 = vmatpush3.msk.msra.mxu1 %vm262_vm0, %v1859_v29  ;;  %2174 = vmatprep.subr.msk.mxu0 %vm262_vm0, %v1949_v43 }
  0x38   : > { %2096 = vmatmul.mubr.msk.f32.gmra.mrb[2].mxu1 %vm237_vm1, %v506_v44  ;;  %2226 = vmatprep.subr.bf16.mxu1 %v2366_v60 }
  0x39   : > { %2152 = vmatmul.mubr.msk.f32.gmra.mrb[2].mxu0 %vm237_vm1, %v221_v32  ;;  %2098 = vmatprep.mubr.msk.f32.mxu1 %vm237_vm1, %v507_v45 }
  0x3a   : > { %2154 = vmatprep.mubr.msk.f32.mxu0 %vm237_vm1, %v222_v34 }
  0x3c   : > { %2099 = vmatmul.mubr.msk.f32.gmra.mrb[4].mxu1 %vm237_vm1, %v508_v46 }
  0x3d   : > { %2155 = vmatmul.mubr.msk.f32.gmra.mrb[4].mxu0 %vm237_vm1, %v223_v36  ;;  %2101 = vmatprep.mubr.msk.f32.mxu1 %vm237_vm1, %v509_v47 }
  0x3e   : > { %2157 = vmatprep.mubr.msk.f32.mxu0 %vm237_vm1, %v224_v38  ;;  %v1557_v38 = vld [vmem:[%s2631_s2] sm:$0x1] }
  0x40   : > { %2102 = vmatmul.mubr.msk.f32.gmra.mrb[6].mxu1 %vm237_vm1, %v510_v48 }
  0x41   : > { %2158 = vmatmul.mubr.msk.f32.gmra.mrb[6].mxu0 %vm237_vm1, %v1912_v49  ;;  %2106 = vmatprep.mubr.msk.f32.mxu1 %vm237_vm1, %v1851_v50 }
  0x42   : > { %2162 = vmatprep.mubr.msk.f32.mxu0 %vm237_vm1, %v2436_v6 }
  0x44   : > { %2107 = vmatmul.mubr.msk.f32.vlgmr.msra.gmra.mrb[0].mxu1 %vm237_vm1, %v1852_v51 }
  0x45   : > { %2163 = vmatmul.mubr.msk.f32.vlgmr.msra.gmra.mrb[0].mxu0 %vm237_vm1, %v2442_v8  ;;  %2109 = vmatprep.mubr.msk.f32.mxu1 %vm237_vm1, %v1853_v52 }
  0x46   : > { %2175 = vmatpush3.msk.msra.mxu0 %vm262_vm0, %v1949_v43  ;;  %2165 = vmatprep.mubr.msk.f32.mxu0 %vm237_vm1, %v2458_v12 }
  0x48   : > { %2110 = vmatmul.mubr.msk.f32.gmra.mrb[2].mxu1 %vm237_vm1, %v1854_v53 }
  0x49   : > { %2166 = vmatmul.mubr.msk.f32.gmra.mrb[2].mxu0 %vm237_vm1, %v2463_v14  ;;  %2112 = vmatprep.mubr.msk.f32.mxu1 %vm237_vm1, %v1855_v54 }
  0x4a   : > { %2168 = vmatprep.mubr.msk.f32.mxu0 %vm237_vm1, %v2476_v16 }
  0x4c   : > { %2113 = vmatmul.mubr.msk.f32.gmra.mrb[4].mxu1 %vm237_vm1, %v1856_v55 }
  0x4d   : > { %2169 = vmatmul.mubr.msk.f32.gmra.mrb[4].mxu0 %vm237_vm1, %v2480_v18  ;;  %2115 = vmatprep.mubr.msk.f32.mxu1 %vm237_vm1, %v1857_v56 }
  0x4e   : > { %2171 = vmatprep.mubr.msk.f32.mxu0 %vm237_vm1, %v2490_v20 }
  0x50   : > { %2116 = vmatmul.mubr.msk.f32.gmra.mrb[6].mxu1 %vm237_vm1, %v1858_v57 }
  0x51   : > { %2172 = vmatmul.mubr.msk.f32.gmra.mrb[6].mxu0 %vm237_vm1, %v1930_v58  ;;  %2204 = vmatprep.mubr.msk.f32.mxu1 %vm2367_vm2, %v2368_v61 }
  0x52   : > { %2176 = vmatprep.mubr.msk.f32.mxu0 %vm237_vm1, %v504_v41 }
  0x55   : > { %2177 = vmatmul.mubr.msk.f32.vlgmr.msra.gmra.mrb[0].mxu0 %vm237_vm1, %v505_v42 }
  0x56   : > { %2179 = vmatprep.mubr.msk.f32.mxu0 %vm237_vm1, %v506_v44 }
  0x59   : > { %2180 = vmatmul.mubr.msk.f32.gmra.mrb[2].mxu0 %vm237_vm1, %v507_v45 }
  0x5a   : > { %2182 = vmatprep.mubr.msk.f32.mxu0 %vm237_vm1, %v508_v46 }
  0x5d   : > { %2183 = vmatmul.mubr.msk.f32.gmra.mrb[4].mxu0 %vm237_vm1, %v509_v47 }
  0x5e   : > { %2185 = vmatprep.mubr.msk.f32.mxu0 %vm237_vm1, %v510_v48 }
  0x61   : > { %2186 = vmatmul.mubr.msk.f32.gmra.mrb[6].mxu0 %vm237_vm1, %v1948_v59 }
 0x117   : > { %v2108_v62 = vpop.f32.mrb[0].mxu1 }
 0x118   : > { %v757_v63 = vpop.f32.mrb[1].mxu1 }
 0x11b   : > { %v2111_v0 = vpop.f32.mrb[2].mxu1 }
 0x11c   : > { %v767_v1 = vpop.f32.mrb[3].mxu1 }
 0x11f   : > { %v2114_v2 = vpop.f32.mrb[4].mxu1 }
 0x120   : > { %v777_v3 = vpop.f32.mrb[5].mxu1 }
 0x123   : > { %v2117_v4 = vpop.f32.mrb[6].mxu1 }
 0x124   : > { %v787_v5 = vpop.f32.mrb[7].mxu1 }
 0x128   : > { %v2178_v6 = vpop.f32.mrb[0].mxu0 }
 0x129   : > { %v2250_v7 = vadd.f32 %v2178_v6, %v2108_v62  ;;  %v1510_v8 = vpop.f32.mrb[1].mxu0 }
 0x12a   : > { %v2251_v9 = vadd.f32 %v1510_v8, %v757_v63 }
 0x12b   : > { %v1635_v10 = vmul.f32 %v2250_v7, %v2250_v7 }
 0x12c   : > { %v2227_v11 = vpack.c.bf16 %v2250_v7, %v2251_v9  ;;  %v1634_v12 = vmul.f32 %v2251_v9, %v2251_v9  ;;  %v2181_v13 = vpop.f32.mrb[2].mxu0 }
 0x12d   : > { %v2252_v14 = vadd.f32 %v2181_v13, %v2111_v0  ;;  %v1520_v15 = vpop.f32.mrb[3].mxu0 }
 0x12e   : > { %v2239_v16 = vpack.c.bf16 %v1635_v10, %v1634_v12  ;;  %v2253_v17 = vadd.f32 %v1520_v15, %v767_v1  ;;  %2228 = vmatpush3.bf16.msra.mxu1 %v2227_v11 }
 0x12f   : > { %v1637_v18 = vmul.f32 %v2252_v14, %v2252_v14  ;;  %2229 = vmatprep.subr.bf16.mxu1 %v2366_v60 }
 0x130   : > { %v2230_v19 = vpack.c.bf16 %v2252_v14, %v2253_v17  ;;  %v1636_v20 = vmul.f32 %v2253_v17, %v2253_v17  ;;  %v2184_v21 = vpop.f32.mrb[4].mxu0 }
 0x131   : > { %v2254_v22 = vadd.f32 %v2184_v21, %v2114_v2  ;;  %v1530_v23 = vpop.f32.mrb[5].mxu0 }
 0x132   : > { %v2242_v24 = vpack.c.bf16 %v1637_v18, %v1636_v20  ;;  %v2255_v25 = vadd.f32 %v1530_v23, %v777_v3  ;;  %2231 = vmatpush3.bf16.msra.mxu1 %v2230_v19 }
 0x133   : > { %v1639_v26 = vmul.f32 %v2254_v22, %v2254_v22  ;;  %2232 = vmatprep.subr.bf16.mxu1 %v2366_v60 }
 0x134   : > { %v2233_v27 = vpack.c.bf16 %v2254_v22, %v2255_v25  ;;  %v1638_v28 = vmul.f32 %v2255_v25, %v2255_v25  ;;  %v2187_v29 = vpop.f32.mrb[6].mxu0 }
 0x135   : > { %v2256_v30 = vadd.f32 %v2187_v29, %v2117_v4  ;;  %v1540_v31 = vpop.f32.mrb[7].mxu0 }
 0x136   : > { %v2245_v32 = vpack.c.bf16 %v1639_v26, %v1638_v28  ;;  %v2257_v33 = vadd.f32 %v1540_v31, %v787_v5  ;;  %2234 = vmatpush3.bf16.msra.mxu1 %v2233_v27 }
 0x137   : > { %v1641_v34 = vmul.f32 %v2256_v30, %v2256_v30  ;;  %2235 = vmatprep.subr.bf16.mxu1 %v2366_v60 }
 0x138   : > { %v2236_v35 = vpack.c.bf16 %v2256_v30, %v2257_v33  ;;  %v1640_v36 = vmul.f32 %v2257_v33, %v2257_v33 }
 0x13a   : > { %v2248_v37 = vpack.c.bf16 %v1641_v34, %v1640_v36  ;;  %2237 = vmatpush3.bf16.msra.mxu1 %v2236_v35 }
 0x13b   : > { %2238 = vmatprep.subr.bf16.mxu1 %v2366_v60 }
 0x13d   : > { %2205 = vmatmul.mubr.msk.f32.vlgmr.msra.gmra.mrb[8].mxu1 %vm1558_vm3, %v1557_v38 }
 0x13e   : > { %2240 = vmatpush3.bf16.msra.mxu1 %v2239_v16  ;;  %2223 = vmatprep.mubr.msk.f32.mxu1 %vm2367_vm2, %v2368_v61 }
 0x13f   : > { %2241 = vmatprep.subr.bf16.mxu1 %v2366_v60 }
 0x142   : > { %2243 = vmatpush3.bf16.msra.mxu1 %v2242_v24 }
 0x143   : > { %2244 = vmatprep.subr.bf16.mxu1 %v2366_v60 }
 0x146   : > { %2246 = vmatpush3.bf16.msra.mxu1 %v2245_v32 }
 0x147   : > { %2247 = vmatprep.subr.bf16.mxu1 %v2366_v60 }
 0x14a   : > { %2249 = vmatpush3.bf16.msra.mxu1 %v2248_v37 }
 0x14d   : > { %2224 = vmatmul.mubr.msk.f32.vlgmr.msra.gmra.mrb[10].mxu1 %vm1558_vm3, %v1557_v38 }
 0x210   : > { %v1628_v39 = vpop.f32.mrb[8].mxu1 }
 0x211   : > { %1633 = vst.msk [vmem:[%s216_s20] sm:$0x1] %vm1632_vm4, %v1628_v39  ;;  %v2206_v40 = vpop.f32.mrb[9].mxu1 }
 0x220   : > { %v1708_v41 = vpop.f32.mrb[10].mxu1 }
 0x221   : > { %1712 = vst.msk [vmem:[%s216_s20 + $0x1] sm:$0x1] %vm1632_vm4, %v1708_v41  ;;  %v2225_v42 = vpop.f32.mrb[11].mxu1 }
 0x222 PF: > { %s13_s14 = sadd.s32 1, %s2364_s14   ;;  %s2633_s12 = smov %s2360_s13 }
 0x223   : > { %p10_p5 = scmp.ge.s32.totalorder %s13_s14, 4   ;;  %s2634_s13 = smov %s2636_s15 }
 0x225   :  { %12 = sbr.rel (!%p10_p5) target bundleno = 2 (0x2), region = 78 }

// kernel: downsample.3
= control target key start
LH: loop header
LB: loop body
LE: loop exit
PB: predicated region body
PF: predicated region fallthrough
CT: control target
= control target key end

     0   :  { %s2225_s15 = smov 0   ;;  %s2227_s16 = smov 0   ;;  %s2492_s0 = inlined_call_operand.vmem [shape: f32[2,1,4,9,9,4], index: 0, kind: input, shape index: {}]   ;;  %s2493_s1 = inlined_call_operand.vmem [shape: f32[9,4,4], index: 1, kind: input, shape index: {}]   ;;  %s2494_s2 = inlined_call_operand.vmem [shape: f32[1,4], index: 2, kind: input, shape index: {}]   ;;  %s2495_s3 = inlined_call_operand.vmem [shape: f32[1,4], index: 3, kind: input, shape index: {}]   ;;  %s2496_s4 = inlined_call_operand.vmem [shape: f32[2,1,64,4], index: 4, kind: output, shape index: {}]  }
   0x1   :  { %s2229_s17 = smov 0  }
   0x2 LB: > { %s26_s18 = sadd.s32 1, %s2194_s16  ;;  %p1724_p0 = scmp.ge.s32.totalorder %s2198_s17, 1  ;;  %s2198_s17 = sphi %s2229_s17, %s14_s17   ;;  %s2194_s16 = sphi %s2227_s16, %s2498_s16   ;;  %s2190_s15 = sphi %s2225_s15, %s2497_s15  }
   0x3   : > { %p28_p1 = scmp.ge.s32.totalorder %s26_s18, 2  ;;  %p182_p2 = scmp.lt.s32.totalorder %s2198_s17, 3 }
   0x5   : > { %s2500_s18 = smov (%p28_p1, %s26_s18), 0  ;;  %p183_p3 = pnand %p1724_p0, %p182_p2 }
   0x6   : > { %v1736_v0 = vld [vmem:[%s2493_s1 + $0x4] sm:$0xf] (!%p183_p3)  ;;  %vm279_vm0 = vcmask (!%p183_p3), 1043456   ;;  %v2249_v1 = vld [vmem:[%s2493_s1 + $0x10] sm:$0xf] (!%p183_p3)  ;;  %p216_p4 = scmp.lt.s32.totalorder (!%p183_p3), %s2190_s15, 1 }
   0x7   : > { %186 = sbr.rel (%p183_p3) target bundleno = 313 (0x139), region = 36  ;;  %1959 = vmatprep.subr.msk.mxu1 (!%p183_p3), %vm279_vm0, %v1736_v0  ;;  %2015 = vmatprep.subr.msk.mxu0 (!%p183_p3), %vm279_vm0, %v2249_v1  ;;  %v242_v2 = vld [vmem:[%s2493_s1] sm:$0xf] (!%p183_p3)  ;;  %v1809_v3 = vld [vmem:[%s2493_s1 + $0x14] sm:$0xf] (!%p183_p3)  ;;  %vm254_vm1 = vcmask (!%p183_p3), 31744  }
   0x8   : > { %1960 = vmatpush3.msk.msra.mxu1 (!%p183_p3), %vm279_vm0, %v1736_v0  ;;  %2016 = vmatpush3.msk.msra.mxu0 (!%p183_p3), %vm279_vm0, %v2249_v1  ;;  %v1827_v10 = vld [vmem:[%s2493_s1 + $0x18] sm:$0xf] (!%p183_p3)  ;;  %v1755_v11 = vld [vmem:[%s2493_s1 + $0x8] sm:$0xf] (!%p183_p3)  ;;  %v1845_v20 = vld [vmem:[%s2493_s1 + $0x1c] sm:$0xf] (!%p183_p3) }
   0x9   : > { %1973 = vmatprep.subr.msk.mxu1 (!%p183_p3), %vm279_vm0, %v242_v2  ;;  %2029 = vmatprep.subr.msk.mxu0 (!%p183_p3), %vm279_vm0, %v1809_v3  ;;  %v1773_v29 = vld [vmem:[%s2493_s1 + $0xc] sm:$0xf] (!%p183_p3)  ;;  %v1863_v35 = vld [vmem:[%s2493_s1 + $0x20] sm:$0xf] (!%p183_p3) }
   0xe   : > { %s2502_s15 = smov (!%p216_p4, %s2190_s15), 1 }
   0xf   : > { %s2151_s27 = smul.u32 576, %s2502_s15  ;;  %s1877_s23 = sshll.u32 %s2502_s15, 6 }
  0x10   : > { %s2465_s26 = scalar_lea.vmem %s2496_s4, %s1877_s23 }
  0x11   : > { %s2271_s30 = scalar_lea.vmem %s2492_s0, %s2151_s27 }
  0x12   : > { %v1728_v4 = vld [vmem:[%s2271_s30 + $0x90] sm:$0xff]  ;;  %v2276_v6 = vld [vmem:[%s2271_s30 + $0xa0] sm:$0xff] }
  0x13   : > { %v1783_v5 = vld [vmem:[%s2271_s30 + $0x1b0] sm:$0xff]  ;;  %1961 = vmatprep.mubr.msk.f32.mxu1 %vm254_vm1, %v1728_v4  ;;  %v1784_v7 = vld [vmem:[%s2271_s30 + $0x1c0] sm:$0xff] }
  0x14   : > { %2017 = vmatprep.mubr.msk.f32.mxu0 %vm254_vm1, %v1783_v5  ;;  %v2282_v8 = vld [vmem:[%s2271_s30 + $0xb0] sm:$0xff]  ;;  %1962 = vmatmul.mubr.msk.f32.vlgmr.msra.gmra.mrb[0].mxu1 %vm254_vm1, %v2276_v6  ;;  %v2297_v12 = vld [vmem:[%s2271_s30 + $0xc0] sm:$0xff] }
  0x15   : > { %v1785_v9 = vld [vmem:[%s2271_s30 + $0x1d0] sm:$0xff]  ;;  %2018 = vmatmul.mubr.msk.f32.vlgmr.msra.gmra.mrb[0].mxu0 %vm254_vm1, %v1784_v7  ;;  %1974 = vmatpush3.msk.msra.mxu1 %vm279_vm0, %v242_v2  ;;  %v1786_v13 = vld [vmem:[%s2271_s30 + $0x1e0] sm:$0xff] }
  0x16   : > { %2030 = vmatpush3.msk.msra.mxu0 %vm279_vm0, %v1809_v3  ;;  %1964 = vmatprep.mubr.msk.f32.mxu1 %vm254_vm1, %v2282_v8  ;;  %v2304_v14 = vld [vmem:[%s2271_s30 + $0xd0] sm:$0xff]  ;;  %v1801_v15 = vld [vmem:[%s2271_s30 + $0x121] sm:$0xff]  ;;  %v1874_v4 = vld [vmem:[%s2495_s3] ss:$0 sm:$0xff] }
  0x17   : > { %2020 = vmatprep.mubr.msk.f32.mxu0 %vm254_vm1, %v1785_v9  ;;  %2043 = vmatprep.subr.msk.mxu0 %vm279_vm0, %v1827_v10  ;;  %v2316_v16 = vld [vmem:[%s2271_s30 + $0xe0] sm:$0xff]  ;;  %v1802_v17 = vld [vmem:[%s2271_s30 + $0x131] sm:$0xff] }
  0x18   : > { %1987 = vmatprep.subr.msk.mxu1 %vm279_vm0, %v1755_v11  ;;  %1965 = vmatmul.mubr.msk.f32.gmra.mrb[2].mxu1 %vm254_vm1, %v2297_v12  ;;  %v2320_v18 = vld [vmem:[%s2271_s30 + $0xf0] sm:$0xff]  ;;  %v1803_v19 = vld [vmem:[%s2271_s30 + $0x141] sm:$0xff] }
  0x19   : > { %2021 = vmatmul.mubr.msk.f32.gmra.mrb[2].mxu0 %vm254_vm1, %v1786_v13  ;;  %1967 = vmatprep.mubr.msk.f32.mxu1 %vm254_vm1, %v2304_v14  ;;  %v2333_v21 = vld [vmem:[%s2271_s30 + $0x100] sm:$0xff]  ;;  %v1804_v22 = vld [vmem:[%s2271_s30 + $0x151] sm:$0xff] }
  0x1a   : > { %2031 = vmatprep.mubr.msk.f32.mxu0 %vm254_vm1, %v1801_v15  ;;  %v234_v23 = vld [vmem:[%s2271_s30] sm:$0xff]  ;;  %v235_v25 = vld [vmem:[%s2271_s30 + $0x10] sm:$0xff] }
  0x1b   : > { %v1805_v24 = vld [vmem:[%s2271_s30 + $0x161] sm:$0xff]  ;;  %v1806_v26 = vld [vmem:[%s2271_s30 + $0x171] sm:$0xff] }
  0x1c   : > { %1968 = vmatmul.mubr.msk.f32.gmra.mrb[4].mxu1 %vm254_vm1, %v2316_v16  ;;  %v236_v27 = vld [vmem:[%s2271_s30 + $0x20] sm:$0xff]  ;;  %v237_v30 = vld [vmem:[%s2271_s30 + $0x30] sm:$0xff] }
  0x1d   : > { %2032 = vmatmul.mubr.msk.f32.vlgmr.msra.gmra.mrb[0].mxu0 %vm254_vm1, %v1802_v17  ;;  %1970 = vmatprep.mubr.msk.f32.mxu1 %vm254_vm1, %v2320_v18  ;;  %v1807_v28 = vld [vmem:[%s2271_s30 + $0x181] sm:$0xff]  ;;  %v1808_v31 = vld [vmem:[%s2271_s30 + $0x191] sm:$0xff] }
  0x1e   : > { %2044 = vmatpush3.msk.msra.mxu0 %vm279_vm0, %v1827_v10  ;;  %2034 = vmatprep.mubr.msk.f32.mxu0 %vm254_vm1, %v1803_v19  ;;  %v238_v32 = vld [vmem:[%s2271_s30 + $0x40] sm:$0xff]  ;;  %v239_v33 = vld [vmem:[%s2271_s30 + $0x50] sm:$0xff] }
  0x1f   : > { %2057 = vmatprep.subr.msk.mxu0 %vm279_vm0, %v1845_v20  ;;  %v240_v34 = vld [vmem:[%s2271_s30 + $0x60] sm:$0xff]  ;;  %v241_v36 = vld [vmem:[%s2271_s30 + $0x70] sm:$0xff] }
  0x20   : > { %1971 = vmatmul.mubr.msk.f32.gmra.mrb[6].mxu1 %vm254_vm1, %v2333_v21  ;;  %v520_v37 = vld [vmem:[%s2271_s30 + $0x1] sm:$0xff]  ;;  %v521_v38 = vld [vmem:[%s2271_s30 + $0x11] sm:$0xff] }
  0x21   : > { %2035 = vmatmul.mubr.msk.f32.gmra.mrb[2].mxu0 %vm254_vm1, %v1804_v22  ;;  %1975 = vmatprep.mubr.msk.f32.mxu1 %vm254_vm1, %v234_v23  ;;  %v522_v39 = vld [vmem:[%s2271_s30 + $0x21] sm:$0xff]  ;;  %v523_v40 = vld [vmem:[%s2271_s30 + $0x31] sm:$0xff] }
  0x22   : > { %2037 = vmatprep.mubr.msk.f32.mxu0 %vm254_vm1, %v1805_v24  ;;  %v1826_v41 = vld [vmem:[%s2271_s30 + $0x80] sm:$0xff]  ;;  %v525_v43 = vld [vmem:[%s2271_s30 + $0x51] sm:$0xff] }
  0x23   : > { %v524_v42 = vld [vmem:[%s2271_s30 + $0x41] sm:$0xff]  ;;  %v527_v45 = vld [vmem:[%s2271_s30 + $0x71] sm:$0xff] }
  0x24   : > { %1976 = vmatmul.mubr.msk.f32.vlgmr.msra.gmra.mrb[0].mxu1 %vm254_vm1, %v235_v25  ;;  %v526_v44 = vld [vmem:[%s2271_s30 + $0x61] sm:$0xff]  ;;  %v1766_v47 = vld [vmem:[%s2271_s30 + $0x130] sm:$0xff] }
  0x25   : > { %2038 = vmatmul.mubr.msk.f32.gmra.mrb[4].mxu0 %vm254_vm1, %v1806_v26  ;;  %1988 = vmatpush3.msk.msra.mxu1 %vm279_vm0, %v1755_v11  ;;  %v1765_v46 = vld [vmem:[%s2271_s30 + $0x120] sm:$0xff]  ;;  %v1768_v49 = vld [vmem:[%s2271_s30 + $0x150] sm:$0xff] }
  0x26   : > { %1978 = vmatprep.mubr.msk.f32.mxu1 %vm254_vm1, %v236_v27  ;;  %2040 = vmatprep.mubr.msk.f32.mxu0 %vm254_vm1, %v1807_v28  ;;  %v1767_v48 = vld [vmem:[%s2271_s30 + $0x140] sm:$0xff]  ;;  %v1844_v50 = vld [vmem:[%s2271_s30 + $0x110] sm:$0xff] }
  0x27   : > { %2001 = vmatprep.subr.msk.mxu1 %vm279_vm0, %v1773_v29  ;;  %v1769_v51 = vld [vmem:[%s2271_s30 + $0x160] sm:$0xff]  ;;  %v1770_v52 = vld [vmem:[%s2271_s30 + $0x170] sm:$0xff] }
  0x28   : > { %1979 = vmatmul.mubr.msk.f32.gmra.mrb[2].mxu1 %vm254_vm1, %v237_v30  ;;  %v1771_v53 = vld [vmem:[%s2271_s30 + $0x180] sm:$0xff]  ;;  %v1772_v54 = vld [vmem:[%s2271_s30 + $0x190] sm:$0xff] }
  0x29   : > { %2041 = vmatmul.mubr.msk.f32.gmra.mrb[6].mxu0 %vm254_vm1, %v1808_v31  ;;  %1981 = vmatprep.mubr.msk.f32.mxu1 %vm254_vm1, %v238_v32  ;;  %v1787_v55 = vld [vmem:[%s2271_s30 + $0x1f0] sm:$0xff]  ;;  %v1788_v56 = vld [vmem:[%s2271_s30 + $0x200] sm:$0xff] }
  0x2a   : > { %2045 = vmatprep.mubr.msk.f32.mxu0 %vm254_vm1, %v235_v25  ;;  %v1789_v57 = vld [vmem:[%s2271_s30 + $0x210] sm:$0xff]  ;;  %v1790_v58 = vld [vmem:[%s2271_s30 + $0x220] sm:$0xff] }
  0x2b   : > { %v1862_v59 = vld [vmem:[%s2271_s30 + $0x81] sm:$0xff] }
  0x2c   : > { %1982 = vmatmul.mubr.msk.f32.gmra.mrb[4].mxu1 %vm254_vm1, %v239_v33 }
  0x2d   : > { %2046 = vmatmul.mubr.msk.f32.vlgmr.msra.gmra.mrb[0].mxu0 %vm254_vm1, %v236_v27  ;;  %1984 = vmatprep.mubr.msk.f32.mxu1 %vm254_vm1, %v240_v34 }
  0x2e   : > { %2058 = vmatpush3.msk.msra.mxu0 %vm279_vm0, %v1845_v20  ;;  %2048 = vmatprep.mubr.msk.f32.mxu0 %vm254_vm1, %v237_v30 }
  0x2f   : > { %2071 = vmatprep.subr.msk.mxu0 %vm279_vm0, %v1863_v35 }
  0x30   : > { %1985 = vmatmul.mubr.msk.f32.gmra.mrb[6].mxu1 %vm254_vm1, %v241_v36 }
  0x31   : > { %2049 = vmatmul.mubr.msk.f32.gmra.mrb[2].mxu0 %vm254_vm1, %v238_v32  ;;  %1989 = vmatprep.mubr.msk.f32.mxu1 %vm254_vm1, %v520_v37 }
  0x32   : > { %2051 = vmatprep.mubr.msk.f32.mxu0 %vm254_vm1, %v239_v33 }
  0x34   : > { %1990 = vmatmul.mubr.msk.f32.vlgmr.msra.gmra.mrb[0].mxu1 %vm254_vm1, %v521_v38 }
  0x35   : > { %2052 = vmatmul.mubr.msk.f32.gmra.mrb[4].mxu0 %vm254_vm1, %v240_v34  ;;  %2002 = vmatpush3.msk.msra.mxu1 %vm279_vm0, %v1773_v29 }
  0x36   : > { %1992 = vmatprep.mubr.msk.f32.mxu1 %vm254_vm1, %v522_v39  ;;  %2054 = vmatprep.mubr.msk.f32.mxu0 %vm254_vm1, %v241_v36 }
  0x37   : > { %2085 = vmatprep.subr.msk.mxu1 %vm279_vm0, %v2249_v1 }
  0x38   : > { %1993 = vmatmul.mubr.msk.f32.gmra.mrb[2].mxu1 %vm254_vm1, %v523_v40 }
  0x39   : > { %2055 = vmatmul.mubr.msk.f32.gmra.mrb[6].mxu0 %vm254_vm1, %v1826_v41  ;;  %1995 = vmatprep.mubr.msk.f32.mxu1 %vm254_vm1, %v524_v42 }
  0x3a   : > { %2059 = vmatprep.mubr.msk.f32.mxu0 %vm254_vm1, %v2276_v6 }
  0x3c   : > { %1996 = vmatmul.mubr.msk.f32.gmra.mrb[4].mxu1 %vm254_vm1, %v525_v43 }
  0x3d   : > { %2060 = vmatmul.mubr.msk.f32.vlgmr.msra.gmra.mrb[0].mxu0 %vm254_vm1, %v2282_v8  ;;  %1998 = vmatprep.mubr.msk.f32.mxu1 %vm254_vm1, %v526_v44 }
  0x3e   : > { %2072 = vmatpush3.msk.msra.mxu0 %vm279_vm0, %v1863_v35  ;;  %2062 = vmatprep.mubr.msk.f32.mxu0 %vm254_vm1, %v2297_v12 }
  0x40   : > { %1999 = vmatmul.mubr.msk.f32.gmra.mrb[6].mxu1 %vm254_vm1, %v527_v45 }
  0x41   : > { %2063 = vmatmul.mubr.msk.f32.gmra.mrb[2].mxu0 %vm254_vm1, %v2304_v14  ;;  %2003 = vmatprep.mubr.msk.f32.mxu1 %vm254_vm1, %v1765_v46 }
  0x42   : > { %2065 = vmatprep.mubr.msk.f32.mxu0 %vm254_vm1, %v2316_v16 }
  0x44   : > { %2004 = vmatmul.mubr.msk.f32.vlgmr.msra.gmra.mrb[0].mxu1 %vm254_vm1, %v1766_v47 }
  0x45   : > { %2066 = vmatmul.mubr.msk.f32.gmra.mrb[4].mxu0 %vm254_vm1, %v2320_v18  ;;  %2086 = vmatpush3.msk.msra.mxu1 %vm279_vm0, %v2249_v1  ;;  %v1873_v1 = vld [vmem:[%s2494_s2] ss:$0 sm:$0xff] }
  0x46   : > { %2006 = vmatprep.mubr.msk.f32.mxu1 %vm254_vm1, %v1767_v48  ;;  %2068 = vmatprep.mubr.msk.f32.mxu0 %vm254_vm1, %v2333_v21 }
  0x48   : > { %2007 = vmatmul.mubr.msk.f32.gmra.mrb[2].mxu1 %vm254_vm1, %v1768_v49 }
  0x49   : > { %2069 = vmatmul.mubr.msk.f32.gmra.mrb[6].mxu0 %vm254_vm1, %v1844_v50  ;;  %2009 = vmatprep.mubr.msk.f32.mxu1 %vm254_vm1, %v1769_v51 }
  0x4a   : > { %2073 = vmatprep.mubr.msk.f32.mxu0 %vm254_vm1, %v521_v38 }
  0x4c   : > { %2010 = vmatmul.mubr.msk.f32.gmra.mrb[4].mxu1 %vm254_vm1, %v1770_v52 }
  0x4d   : > { %2074 = vmatmul.mubr.msk.f32.vlgmr.msra.gmra.mrb[0].mxu0 %vm254_vm1, %v522_v39  ;;  %2012 = vmatprep.mubr.msk.f32.mxu1 %vm254_vm1, %v1771_v53 }
  0x4e   : > { %2076 = vmatprep.mubr.msk.f32.mxu0 %vm254_vm1, %v523_v40 }
  0x50   : > { %2013 = vmatmul.mubr.msk.f32.gmra.mrb[6].mxu1 %vm254_vm1, %v1772_v54 }
  0x51   : > { %2077 = vmatmul.mubr.msk.f32.gmra.mrb[2].mxu0 %vm254_vm1, %v524_v42  ;;  %2023 = vmatprep.mubr.msk.f32.mxu1 %vm254_vm1, %v1787_v55 }
  0x52   : > { %2079 = vmatprep.mubr.msk.f32.mxu0 %vm254_vm1, %v525_v43 }
  0x54   : > { %2024 = vmatmul.mubr.msk.f32.vlgmr.msra.gmra.mrb[4].mxu1 %vm254_vm1, %v1788_v56 }
  0x55   : > { %2080 = vmatmul.mubr.msk.f32.gmra.mrb[4].mxu0 %vm254_vm1, %v526_v44  ;;  %2026 = vmatprep.mubr.msk.f32.mxu1 %vm254_vm1, %v1789_v57 }
  0x56   : > { %2082 = vmatprep.mubr.msk.f32.mxu0 %vm254_vm1, %v527_v45 }
  0x58   : > { %2027 = vmatmul.mubr.msk.f32.gmra.mrb[6].mxu1 %vm254_vm1, %v1790_v58 }
  0x59   : > { %2083 = vmatmul.mubr.msk.f32.gmra.mrb[6].mxu0 %vm254_vm1, %v1862_v59 }
 0x117   : > { %v2005_v60 = vpop.f32.mrb[0].mxu1 }
 0x118   : > { %v774_v61 = vpop.f32.mrb[1].mxu1 }
 0x11b   : > { %v2008_v62 = vpop.f32.mrb[2].mxu1 }
 0x11c   : > { %v784_v63 = vpop.f32.mrb[3].mxu1 }
 0x120   : > { %v2075_v0 = vpop.f32.mrb[0].mxu0 }
 0x121   : > { %v2087_v2 = vadd.f32 %v2075_v0, %v2005_v60  ;;  %v1527_v3 = vpop.f32.mrb[1].mxu0 }
 0x122   : > { %v2088_v5 = vadd.f32 %v1527_v3, %v774_v61 }
 0x123   : > { %v1582_v6 = vmul.f32 %v2087_v2, %v1873_v1 }
 0x124   : > { %v1581_v7 = vmul.f32 %v2088_v5, %v1873_v1  ;;  %v2078_v8 = vpop.f32.mrb[2].mxu0 }
 0x125   : > { %v1597_v9 = vadd.f32 %v1874_v4, %v1582_v6  ;;  %v2089_v10 = vadd.f32 %v2078_v8, %v2008_v62  ;;  %v1537_v11 = vpop.f32.mrb[3].mxu0 }
 0x126   : > { %v1596_v12 = vadd.f32 %v1874_v4, %v1581_v7  ;;  %v2090_v13 = vadd.f32 %v1537_v11, %v784_v63 }
 0x127   : > { %v1605_v14 = vmul.f32 0.01, %v1597_v9  ;;  %v1584_v15 = vmul.f32 %v2089_v10, %v1873_v1  ;;  %v2025_v18 = vpop.f32.mrb[4].mxu1 }
 0x128   : > { %v1604_v16 = vmul.f32 0.01, %v1596_v12  ;;  %v1583_v17 = vmul.f32 %v2090_v13, %v1873_v1  ;;  %v2081_v19 = vpop.f32.mrb[4].mxu0  ;;  %v945_v23 = vpop.f32.mrb[5].mxu1 }
 0x129   : > { %v1613_v20 = vmax.f32 %v1597_v9, %v1605_v14  ;;  %v1599_v21 = vadd.f32 %v1874_v4, %v1584_v15  ;;  %v2091_v22 = vadd.f32 %v2081_v19, %v2025_v18  ;;  %v1547_v24 = vpop.f32.mrb[5].mxu0 }
 0x12a   : > { %v1612_v25 = vmax.f32 %v1596_v12, %v1604_v16  ;;  %v1598_v26 = vadd.f32 %v1874_v4, %v1583_v17  ;;  %v2092_v27 = vadd.f32 %v1547_v24, %v945_v23 }
 0x12b   : > { %1621 = vst.msk [vmem:[%s2465_s26 + $0x8] sm:$0xff] %vm254_vm1, %v1613_v20  ;;  %v1607_v28 = vmul.f32 0.01, %v1599_v21  ;;  %v1586_v29 = vmul.f32 %v2091_v22, %v1873_v1  ;;  %v2028_v32 = vpop.f32.mrb[6].mxu1 }
 0x12c   : > { %1620 = vst.msk [vmem:[%s2465_s26] sm:$0xff] %vm254_vm1, %v1612_v25  ;;  %v1606_v30 = vmul.f32 0.01, %v1598_v26  ;;  %v1585_v31 = vmul.f32 %v2092_v27, %v1873_v1  ;;  %v2084_v33 = vpop.f32.mrb[6].mxu0  ;;  %v955_v37 = vpop.f32.mrb[7].mxu1 }
 0x12d   : > { %v1615_v34 = vmax.f32 %v1599_v21, %v1607_v28  ;;  %v1601_v35 = vadd.f32 %v1874_v4, %v1586_v29  ;;  %v2093_v36 = vadd.f32 %v2084_v33, %v2028_v32  ;;  %v1557_v38 = vpop.f32.mrb[7].mxu0 }
 0x12e   : > { %v1614_v39 = vmax.f32 %v1598_v26, %v1606_v30  ;;  %v1600_v40 = vadd.f32 %v1874_v4, %v1585_v31  ;;  %v2094_v41 = vadd.f32 %v1557_v38, %v955_v37 }
 0x12f   : > { %1623 = vst.msk [vmem:[%s2465_s26 + $0x18] sm:$0xff] %vm254_vm1, %v1615_v34  ;;  %v1609_v42 = vmul.f32 0.01, %v1601_v35  ;;  %v1588_v43 = vmul.f32 %v2093_v36, %v1873_v1 }
 0x130   : > { %1622 = vst.msk [vmem:[%s2465_s26 + $0x10] sm:$0xff] %vm254_vm1, %v1614_v39  ;;  %v1608_v44 = vmul.f32 0.01, %v1600_v40  ;;  %v1587_v45 = vmul.f32 %v2094_v41, %v1873_v1 }
 0x131   : > { %v1617_v46 = vmax.f32 %v1601_v35, %v1609_v42  ;;  %v1603_v47 = vadd.f32 %v1874_v4, %v1588_v43 }
 0x132   : > { %v1616_v48 = vmax.f32 %v1600_v40, %v1608_v44  ;;  %v1602_v49 = vadd.f32 %v1874_v4, %v1587_v45 }
 0x133   : > { %1625 = vst.msk [vmem:[%s2465_s26 + $0x28] sm:$0xff] %vm254_vm1, %v1617_v46  ;;  %v1611_v50 = vmul.f32 0.01, %v1603_v47 }
 0x134   : > { %1624 = vst.msk [vmem:[%s2465_s26 + $0x20] sm:$0xff] %vm254_vm1, %v1616_v48  ;;  %v1610_v51 = vmul.f32 0.01, %v1602_v49 }
 0x135   : > { %v1619_v52 = vmax.f32 %v1603_v47, %v1611_v50 }
 0x136   : > { %v1618_v53 = vmax.f32 %v1602_v49, %v1610_v51 }
 0x137   : > { %1627 = vst.msk [vmem:[%s2465_s26 + $0x38] sm:$0xff] %vm254_vm1, %v1619_v52 }
 0x138   : > { %1626 = vst.msk [vmem:[%s2465_s26 + $0x30] sm:$0xff] %vm254_vm1, %v1618_v53 }
 0x139 PF: > { %s14_s17 = sadd.s32 1, %s2198_s17   ;;  %s2497_s15 = smov %s2194_s16 }
 0x13a   : > { %p11_p5 = scmp.ge.s32.totalorder %s14_s17, 4   ;;  %s2498_s16 = smov %s2500_s18 }
 0x13c   :  { %13 = sbr.rel (!%p11_p5) target bundleno = 2 (0x2), region = 79 }

</bundles_post_ra>
